<compile_context>
chip_gen: v7x
topology: tpu7x:2x2x1
jax: 0.10.0
libtpu: 0.0.40
codegen_flags: <defaults>
</compile_context>

<pallas_src>
from functools import partial

import jax
import jax.numpy as jnp
import numpy as np
from jax import lax
from jax.experimental import pallas as pl
from jax.experimental.pallas import tpu as pltpu


# ----------------------------------------------------------------------------
# Fused 2-layer GRU kernel.  Grid = (batch_blocks, time_tiles); the serial
# recurrence over the tT steps of a tile runs in an in-kernel fori_loop.
# ----------------------------------------------------------------------------
def encoder_gru_kernel(emb_ref, wih1_ref, bx1_ref, wfused_ref, whh2_ref,
                       bx2_ref, bhn1_ref, bhn2_ref,
                       y_ref, hN_ref,
                       gx1_s, h1_s, h2_s, hp1_s):
    tT, tB, Ep = emb_ref.shape
    Hp = y_ref.shape[-1]
    mxu_dtype = wfused_ref.dtype
    t_blk = pl.program_id(1)

    # Reset carries at the start of every batch-block's sequence.
    @pl.when(t_blk == 0)
    def _():
        h1_s[...] = jnp.zeros_like(h1_s)
        h2_s[...] = jnp.zeros_like(h2_s)
        hp1_s[...] = jnp.zeros_like(hp1_s)     # h0 @ W_hh1 == 0

    # Layer-1 input projection for the whole tile, off the serial critical
    # path: one (tT*tB, Ep) x (Ep, 3Hp) MXU matmul, f32 accumulation.
    emb2d = emb_ref[...].reshape(tT * tB, Ep).astype(mxu_dtype)
    gx1_s[...] = (jnp.dot(emb2d, wih1_ref[...],
                          preferred_element_type=jnp.float32)
                  + bx1_ref[...])

    # Invariant weights + bias broadcasts hoisted out of the time loop
    # (JAX does not CSE broadcast_in_dim inside the unrolled loop).
    w_fused = wfused_ref[...]                  # (Hp, 6Hp) = [W_ih2 | W_hh1]
    whh2 = whh2_ref[...]                       # (Hp, 3Hp)
    bx2 = jnp.broadcast_to(bx2_ref[...], (tB, 3 * Hp))
    bhn1 = jnp.broadcast_to(bhn1_ref[...], (tB, Hp))
    bhn2 = jnp.broadcast_to(bhn2_ref[...], (tB, Hp))

    def gates(gx, hp, h, bhn):
        # gx has b_ih (+ b_hh for r/z) folded in; b_hn stays inside r*(.).
        r = jax.nn.sigmoid(gx[:, 0:Hp] + hp[:, 0:Hp])
        z = jax.nn.sigmoid(gx[:, Hp:2 * Hp] + hp[:, Hp:2 * Hp])
        n = jnp.tanh(gx[:, 2 * Hp:] + r * (hp[:, 2 * Hp:] + bhn))
        return (1.0 - z) * n + z * h

    def step(t, carry):
        h1, h2, hp1 = carry
        # Layer-2 hidden matmul depends only on h2(t-1): issue it first so it
        # overlaps the layer-1 gate math.
        hp2 = jnp.dot(h2.astype(mxu_dtype), whh2,
                      preferred_element_type=jnp.float32)
        row = pl.multiple_of(t * tB, tB)
        gx1 = gx1_s[pl.ds(row, tB), :]
        h1n = gates(gx1, hp1, h1, bhn1)
        # Fused (tB,Hp)x(Hp,6Hp): layer-2 input gates AND next step's layer-1
        # hidden projection from a single MXU push.
        fused = jnp.dot(h1n.astype(mxu_dtype), w_fused,
                        preferred_element_type=jnp.float32)
        gx2 = fused[:, 0:3 * Hp] + bx2
        hp1_next = fused[:, 3 * Hp:]
        h2n = gates(gx2, hp2, h2, bhn2)
        y_ref[t] = h2n.astype(y_ref.dtype)     # lane-dense (Hp % 128 == 0)
        return (h1n, h2n, hp1_next)

    carry0 = (h1_s[...], h2_s[...], hp1_s[...])
    # Small tile -> full unroll of the tile only (not of the whole sequence).
    h1l, h2l, hp1l = lax.fori_loop(0, tT, step, carry0, unroll=True)

    h1_s[...] = h1l
    h2_s[...] = h2l
    hp1_s[...] = hp1l

    @pl.when(t_blk == pl.num_programs(1) - 1)
    def _():
        hN_ref[0] = h1l.astype(hN_ref.dtype)
        hN_ref[1] = h2l.astype(hN_ref.dtype)


# ----------------------------------------------------------------------------
# Parameter init (PyTorch-style U(-1/sqrt(H), 1/sqrt(H)) for GRU, N(0,1) emb).
# Weights stored with gates concatenated along the output dim (r, z, n):
#   w_ih: (E_in, 3H), w_hh: (H, 3H), b_ih/b_hh: (3H,)
# ----------------------------------------------------------------------------
def init_encoder_params(key, vocab_size, embedding_size, hidden_size,
                        num_layers=2):
    params = {}
    key, k_emb = jax.random.split(key)
    params["embedding"] = jax.random.normal(
        k_emb, (vocab_size, embedding_size), jnp.float32)
    bound = 1.0 / np.sqrt(hidden_size)
    layers = []
    for layer in range(num_layers):
        in_size = embedding_size if layer == 0 else hidden_size
        key, k1, k2, k3, k4 = jax.random.split(key, 5)
        w_ih = jax.random.uniform(k1, (in_size, 3 * hidden_size), jnp.float32,
                                  -bound, bound)
        w_hh = jax.random.uniform(k2, (hidden_size, 3 * hidden_size),
                                  jnp.float32, -bound, bound)
        b_ih = jax.random.uniform(k3, (3 * hidden_size,), jnp.float32,
                                  -bound, bound)
        b_hh = jax.random.uniform(k4, (3 * hidden_size,), jnp.float32,
                                  -bound, bound)
        layers.append((w_ih, w_hh, b_ih, b_hh))
    params["gru"] = layers
    return params


# ----------------------------------------------------------------------------
# Packing helpers: bias folding + exact zero padding (padded hidden lanes stay
# exactly zero through the recurrence because padded weights/biases are zero
# and h0 = 0).
# ----------------------------------------------------------------------------
def _round_up(x, m):
    return (x + m - 1) // m * m


def _pick_time_tile(T, max_tile):
    for tt in range(min(T, max_tile), 0, -1):
        if T % tt == 0:
            return tt
    return 1


def _fold_bias(b_ih, b_hh, H):
    # r/z gates: both biases commute with the sums -> fold into input gates.
    # n gate: only b_in folds; b_hn must stay inside r * (h @ W_hn + b_hn).
    return jnp.concatenate([b_ih[0:H] + b_hh[0:H],
                            b_ih[H:2 * H] + b_hh[H:2 * H],
                            b_ih[2 * H:3 * H]])


def _pad_gate_mat(w, in_pad, H, Hp):
    # (in_dim, 3H) -> (in_pad, 3Hp) keeping each gate on an Hp boundary.
    in_dim = w.shape[0]
    w = w.reshape(in_dim, 3, H)
    w = jnp.pad(w, ((0, in_pad - in_dim), (0, 0), (0, Hp - H)))
    return w.reshape(in_pad, 3 * Hp)


def _pad_gate_vec(b, H, Hp):
    b = b.reshape(3, H)
    b = jnp.pad(b, ((0, 0), (0, Hp - H)))
    return b.reshape(3 * Hp)


# ----------------------------------------------------------------------------
# Encoder forward: embedding lookup (XLA gather) + fused 2-layer Pallas GRU.
# ----------------------------------------------------------------------------
@partial(jax.jit, static_argnames=("mxu_dtype", "max_time_tile"))
def encoder_forward(params, input_sequence, mxu_dtype=jnp.bfloat16,
                    max_time_tile=8):
    """(T, B) int32 token ids -> (outputs (T,B,H), hidden (2,B,H))."""
    emb_table = params["embedding"]
    # The fused kernel is specialized to the module's default num_layers=2.
    (w_ih1, w_hh1, b_ih1, b_hh1), (w_ih2, w_hh2, b_ih2, b_hh2) = params["gru"]
    T, B = input_sequence.shape
    E = emb_table.shape[1]
    H = w_hh1.shape[0]

    # Lane/sublane padding (exact, see helpers above).
    Ep = _round_up(E, 128)
    Hp = _round_up(H, 128)
    Bp = _round_up(B, 8)
    tB = 32 if Bp % 32 == 0 else 8
    tT = _pick_time_tile(T, max_time_tile)
    nb, nt = Bp // tB, T // tT

    # TODO(synk): optionally fuse the embedding gather into the kernel via
    # scalar-prefetched token ids + pl.Element row index_map.
    embedded = jnp.take(emb_table, input_sequence, axis=0)        # (T, B, E)
    embedded = jnp.pad(embedded, ((0, 0), (0, Bp - B), (0, Ep - E)))

    # Weight packing: pad, concatenate [W_ih2 | W_hh1] for the fused matmul,
    # cast MXU operands to mxu_dtype (bf16 recommended on v6e/v7x).
    wih1 = _pad_gate_mat(w_ih1, Ep, H, Hp).astype(mxu_dtype)      # (Ep, 3Hp)
    whh1 = _pad_gate_mat(w_hh1, Hp, H, Hp)
    wih2 = _pad_gate_mat(w_ih2, Hp, H, Hp)
    w_fused = jnp.concatenate([wih2, whh1], axis=1).astype(mxu_dtype)  # (Hp,6Hp)
    whh2 = _pad_gate_mat(w_hh2, Hp, H, Hp).astype(mxu_dtype)      # (Hp, 3Hp)

    bx1 = _pad_gate_vec(_fold_bias(b_ih1, b_hh1, H), H, Hp).reshape(1, 3 * Hp)
    bx2 = _pad_gate_vec(_fold_bias(b_ih2, b_hh2, H), H, Hp).reshape(1, 3 * Hp)
    bhn1 = jnp.pad(b_hh1[2 * H:3 * H], (0, Hp - H)).reshape(1, Hp)
    bhn2 = jnp.pad(b_hh2[2 * H:3 * H], (0, Hp - H)).reshape(1, Hp)

    # VMEM budget from the actual tile footprint (double-buffered streams).
    mxu_bytes = jnp.dtype(mxu_dtype).itemsize
    w_bytes = (Ep * 3 * Hp + Hp * 6 * Hp + Hp * 3 * Hp) * mxu_bytes
    b_bytes = (2 * 3 * Hp + 2 * Hp) * 4
    stream = (tT * tB * Ep + tT * tB * Hp + 2 * tB * Hp) * 4
    scratch = (tT * tB * 3 * Hp + 2 * tB * Hp + tB * 3 * Hp) * 4
    vmem_bytes = int(min(max(2 * (stream + w_bytes + b_bytes) + scratch
                             + (4 << 20), 8 << 20), 64 << 20))

    flops = 2 * T * Bp * (Ep * 3 * Hp + Hp * 6 * Hp + Hp * 3 * Hp)
    transcendentals = 6 * T * Bp * Hp
    bytes_accessed = (T * Bp * Ep * 4 + T * Bp * Hp * 4 + 2 * Bp * Hp * 4
                      + w_bytes + b_bytes)

    # NOTE: nn.GRU dropout acts only between layers during training; this is
    # the inference forward, so dropout is a no-op.
    y, hN = pl.pallas_call(
        encoder_gru_kernel,
        out_shape=(jax.ShapeDtypeStruct((T, Bp, Hp), jnp.float32),
                   jax.ShapeDtypeStruct((2, Bp, Hp), jnp.float32)),
        grid_spec=pltpu.PrefetchScalarGridSpec(
            num_scalar_prefetch=0,
            grid=(nb, nt),
            in_specs=[
                pl.BlockSpec((tT, tB, Ep), lambda b, t: (t, b, 0)),   # emb tile
                pl.BlockSpec((Ep, 3 * Hp), lambda b, t: (0, 0)),      # W_ih1
                pl.BlockSpec((1, 3 * Hp), lambda b, t: (0, 0)),       # folded b1
                pl.BlockSpec((Hp, 6 * Hp), lambda b, t: (0, 0)),      # [Wih2|Whh1]
                pl.BlockSpec((Hp, 3 * Hp), lambda b, t: (0, 0)),      # W_hh2
                pl.BlockSpec((1, 3 * Hp), lambda b, t: (0, 0)),       # folded b2
                pl.BlockSpec((1, Hp), lambda b, t: (0, 0)),           # b_hn1
                pl.BlockSpec((1, Hp), lambda b, t: (0, 0)),           # b_hn2
            ],
            out_specs=[
                pl.BlockSpec((tT, tB, Hp), lambda b, t: (t, b, 0)),   # outputs
                pl.BlockSpec((2, tB, Hp), lambda b, t: (0, b, 0)),    # final h
            ],
            scratch_shapes=[
                pltpu.VMEM((tT * tB, 3 * Hp), jnp.float32),   # gx1 tile
                pltpu.VMEM((tB, Hp), jnp.float32),            # h1 carry
                pltpu.VMEM((tB, Hp), jnp.float32),            # h2 carry
                pltpu.VMEM((tB, 3 * Hp), jnp.float32),        # hp1 carry
            ]),
        compiler_params=pltpu.CompilerParams(
            dimension_semantics=("parallel", "arbitrary"),
            vmem_limit_bytes=vmem_bytes),
        cost_estimate=pl.CostEstimate(flops=flops,
                                      transcendentals=transcendentals,
                                      bytes_accessed=bytes_accessed),
    )(embedded, wih1, bx1, w_fused, whh2, bx2, bhn1, bhn2)

    return y[:, :B, :H], hN[:, :B, :H]


# ----------------------------------------------------------------------------
# Pure-JAX reference (lax.scan) for correctness checks.
# ----------------------------------------------------------------------------
def gru_layer_ref(x, w_ih, w_hh, b_ih, b_hh):
    H = w_hh.shape[0]
    B = x.shape[1]

    def step(h, x_t):
        gi = x_t @ w_ih + b_ih
        gh = h @ w_hh + b_hh
        r = jax.nn.sigmoid(gi[:, 0:H] + gh[:, 0:H])
        z = jax.nn.sigmoid(gi[:, H:2 * H] + gh[:, H:2 * H])
        n = jnp.tanh(gi[:, 2 * H:3 * H] + r * gh[:, 2 * H:3 * H])
        h_new = (1.0 - z) * n + z * h
        return h_new, h_new

    h0 = jnp.zeros((B, H), jnp.float32)
    h_last, ys = lax.scan(step, h0, x)
    return ys, h_last


def encoder_forward_ref(params, input_sequence):
    x = jnp.take(params["embedding"], input_sequence, axis=0)
    hiddens = []
    for (w_ih, w_hh, b_ih, b_hh) in params["gru"]:
        x, h_last = gru_layer_ref(x, w_ih, w_hh, b_ih, b_hh)
        hiddens.append(h_last)
    return x, jnp.stack(hiddens, axis=0)


if __name__ == "__main__":
    VOCAB, EMB, HID, NUM_LAYERS = 50, 32, 32, 2
    T, B = 8, 2

    key = jax.random.PRNGKey(0)
    key, k_tok = jax.random.split(key)
    params = init_encoder_params(key, VOCAB, EMB, HID, NUM_LAYERS)
    input_sequence = jax.random.randint(k_tok, (T, B), 0, VOCAB, jnp.int32)

    out_ref, hid_ref = encoder_forward_ref(params, input_sequence)

    # f32 MXU path: tight check against the pure-JAX reference.
    # max_time_tile=4 -> 2 time tiles, exercising the scratch carry across
    # grid steps.
    y32, h32 = jax.block_until_ready(
        encoder_forward(params, input_sequence,
                        mxu_dtype=jnp.float32, max_time_tile=4))
    assert y32.shape == (T, B, HID)
    assert h32.shape == (NUM_LAYERS, B, HID)
    np.testing.assert_allclose(np.asarray(y32), np.asarray(out_ref),
                               rtol=5e-4, atol=1e-4)
    np.testing.assert_allclose(np.asarray(h32), np.asarray(hid_ref),
                               rtol=5e-4, atol=1e-4)

    # bf16 MXU operand path (recommended on v6e/v7x): gate math and carries
    # stay f32, so only operand rounding differs -> loose tolerance.
    ybf, hbf = jax.block_until_ready(
        encoder_forward(params, input_sequence, max_time_tile=4))
    assert ybf.shape == (T, B, HID)
    assert hbf.shape == (NUM_LAYERS, B, HID)
    np.testing.assert_allclose(np.asarray(ybf), np.asarray(out_ref),
                               rtol=3e-2, atol=3e-2)
    np.testing.assert_allclose(np.asarray(hbf), np.asarray(hid_ref),
                               rtol=3e-2, atol=3e-2)

    print("KERNEL_OK")
</pallas_src>

<mosaic_0001>
module attributes {stable_mosaic.version = 11 : i64} {
  func.func @encoder_gru_kernel(%arg0: i32, %arg1: i32, %arg2: memref<4x8x128xf32, #tpu.memory_space<vmem>>, %arg3: memref<128x384xf32, #tpu.memory_space<vmem>>, %arg4: memref<1x384xf32, #tpu.memory_space<vmem>>, %arg5: memref<128x768xf32, #tpu.memory_space<vmem>>, %arg6: memref<128x384xf32, #tpu.memory_space<vmem>>, %arg7: memref<1x384xf32, #tpu.memory_space<vmem>>, %arg8: memref<1x128xf32, #tpu.memory_space<vmem>>, %arg9: memref<1x128xf32, #tpu.memory_space<vmem>>, %arg10: memref<4x8x128xf32, #tpu.memory_space<vmem>>, %arg11: memref<2x8x128xf32, #tpu.memory_space<vmem>>, %arg12: memref<32x384xf32, #tpu.memory_space<vmem>>, %arg13: memref<8x128xf32, #tpu.memory_space<vmem>>, %arg14: memref<8x128xf32, #tpu.memory_space<vmem>>, %arg15: memref<8x384xf32, #tpu.memory_space<vmem>>) attributes {dimension_semantics = [#tpu.dimension_semantics<parallel>, #tpu.dimension_semantics<arbitrary>], iteration_bounds = array<i64: 1, 2>, scalar_prefetch = 0 : i64, scratch_operands = 4 : i64, tpu.core_type = #tpu.core_type<tc>, window_params = [{transform_indices = @transform_0, window_bounds = array<i64: 4, 8, 128>}, {pipeline_mode = #tpu.pipeline_mode<synchronous>, transform_indices = @transform_1, window_bounds = array<i64: 128, 384>}, {pipeline_mode = #tpu.pipeline_mode<synchronous>, transform_indices = @transform_2, window_bounds = array<i64: 1, 384>}, {pipeline_mode = #tpu.pipeline_mode<synchronous>, transform_indices = @transform_3, window_bounds = array<i64: 128, 768>}, {pipeline_mode = #tpu.pipeline_mode<synchronous>, transform_indices = @transform_4, window_bounds = array<i64: 128, 384>}, {pipeline_mode = #tpu.pipeline_mode<synchronous>, transform_indices = @transform_5, window_bounds = array<i64: 1, 384>}, {pipeline_mode = #tpu.pipeline_mode<synchronous>, transform_indices = @transform_6, window_bounds = array<i64: 1, 128>}, {pipeline_mode = #tpu.pipeline_mode<synchronous>, transform_indices = @transform_7, window_bounds = array<i64: 1, 128>}, {transform_indices = @transform_8, window_bounds = array<i64: 4, 8, 128>}, {transform_indices = @transform_9, window_bounds = array<i64: 2, 8, 128>}]} {
    %c0_i32 = arith.constant 0 : i32
    %0 = arith.cmpi eq, %arg1, %c0_i32 : i32
    %1 = arith.extui %0 : i1 to i32
    %c0_i32_0 = arith.constant 0 : i32
    %2 = arith.cmpi ne, %1, %c0_i32_0 : i32
    scf.if %2 {
      %cst_81 = arith.constant 0.000000e+00 : f32
      %299 = vector.broadcast %cst_81 : f32 to vector<8x128xf32>
      %c0_82 = arith.constant 0 : index
      %c0_83 = arith.constant 0 : index
      %300 = vector.load %arg13[%c0_82, %c0_83] : memref<8x128xf32, #tpu.memory_space<vmem>>, vector<8x128xf32>
      tpu.vector_store %arg13[%c0_82, %c0_83], %299 {strides = array<i32>} : memref<8x128xf32, #tpu.memory_space<vmem>>, vector<8x128xf32>,
      %cst_84 = arith.constant 0.000000e+00 : f32
      %301 = vector.broadcast %cst_84 : f32 to vector<8x128xf32>
      %c0_85 = arith.constant 0 : index
      %c0_86 = arith.constant 0 : index
      %302 = vector.load %arg14[%c0_85, %c0_86] : memref<8x128xf32, #tpu.memory_space<vmem>>, vector<8x128xf32>
      tpu.vector_store %arg14[%c0_85, %c0_86], %301 {strides = array<i32>} : memref<8x128xf32, #tpu.memory_space<vmem>>, vector<8x128xf32>,
      %cst_87 = arith.constant 0.000000e+00 : f32
      %303 = vector.broadcast %cst_87 : f32 to vector<8x384xf32>
      %c0_88 = arith.constant 0 : index
      %c0_89 = arith.constant 0 : index
      %304 = vector.load %arg15[%c0_88, %c0_89] : memref<8x384xf32, #tpu.memory_space<vmem>>, vector<8x384xf32>
      tpu.vector_store %arg15[%c0_88, %c0_89], %303 {strides = array<i32>} : memref<8x384xf32, #tpu.memory_space<vmem>>, vector<8x384xf32>,
    } else {
    }
    %c0 = arith.constant 0 : index
    %c0_1 = arith.constant 0 : index
    %c0_2 = arith.constant 0 : index
    %3 = vector.load %arg2[%c0, %c0_1, %c0_2] : memref<4x8x128xf32, #tpu.memory_space<vmem>>, vector<4x8x128xf32>
    %4 = vector.shape_cast %3 : vector<4x8x128xf32> to vector<32x128xf32>
    %c0_3 = arith.constant 0 : index
    %c0_4 = arith.constant 0 : index
    %5 = vector.load %arg3[%c0_3, %c0_4] : memref<128x384xf32, #tpu.memory_space<vmem>>, vector<128x384xf32>
    %cst = arith.constant dense<0.000000e+00> : vector<32x384xf32>
    %6 = tpu.matmul %4, %5, %cst {dimension_numbers = #tpu.dot_dimension_numbers<[1], [0], [0], [1], [0, 0, 1, 1], [], []>} : vector<32x128xf32>, vector<128x384xf32>, vector<32x384xf32> -> vector<32x384xf32>
    %c0_5 = arith.constant 0 : index
    %c0_6 = arith.constant 0 : index
    %7 = vector.load %arg4[%c0_5, %c0_6] : memref<1x384xf32, #tpu.memory_space<vmem>>, vector<1x384xf32>
    %8 = vector.broadcast %7 : vector<1x384xf32> to vector<32x384xf32>
    %9 = arith.addf %6, %8 : vector<32x384xf32>
    %c0_7 = arith.constant 0 : index
    %c0_8 = arith.constant 0 : index
    %10 = vector.load %arg12[%c0_7, %c0_8] : memref<32x384xf32, #tpu.memory_space<vmem>>, vector<32x384xf32>
    tpu.vector_store %arg12[%c0_7, %c0_8], %9 {strides = array<i32>} : memref<32x384xf32, #tpu.memory_space<vmem>>, vector<32x384xf32>,
    %c0_9 = arith.constant 0 : index
    %c0_10 = arith.constant 0 : index
    %11 = vector.load %arg5[%c0_9, %c0_10] : memref<128x768xf32, #tpu.memory_space<vmem>>, vector<128x768xf32>
    %c0_11 = arith.constant 0 : index
    %c0_12 = arith.constant 0 : index
    %12 = vector.load %arg6[%c0_11, %c0_12] : memref<128x384xf32, #tpu.memory_space<vmem>>, vector<128x384xf32>
    %c0_13 = arith.constant 0 : index
    %c0_14 = arith.constant 0 : index
    %13 = vector.load %arg7[%c0_13, %c0_14] : memref<1x384xf32, #tpu.memory_space<vmem>>, vector<1x384xf32>
    %14 = vector.shape_cast %13 : vector<1x384xf32> to vector<1x384xf32>
    %15 = vector.broadcast %14 : vector<1x384xf32> to vector<8x384xf32>
    %c0_15 = arith.constant 0 : index
    %c0_16 = arith.constant 0 : index
    %16 = vector.load %arg8[%c0_15, %c0_16] : memref<1x128xf32, #tpu.memory_space<vmem>>, vector<1x128xf32>
    %17 = vector.shape_cast %16 : vector<1x128xf32> to vector<1x128xf32>
    %18 = vector.broadcast %17 : vector<1x128xf32> to vector<8x128xf32>
    %c0_17 = arith.constant 0 : index
    %c0_18 = arith.constant 0 : index
    %19 = vector.load %arg9[%c0_17, %c0_18] : memref<1x128xf32, #tpu.memory_space<vmem>>, vector<1x128xf32>
    %20 = vector.shape_cast %19 : vector<1x128xf32> to vector<1x128xf32>
    %21 = vector.broadcast %20 : vector<1x128xf32> to vector<8x128xf32>
    %c0_19 = arith.constant 0 : index
    %c0_20 = arith.constant 0 : index
    %22 = vector.load %arg13[%c0_19, %c0_20] : memref<8x128xf32, #tpu.memory_space<vmem>>, vector<8x128xf32>
    %c0_21 = arith.constant 0 : index
    %c0_22 = arith.constant 0 : index
    %23 = vector.load %arg14[%c0_21, %c0_22] : memref<8x128xf32, #tpu.memory_space<vmem>>, vector<8x128xf32>
    %c0_23 = arith.constant 0 : index
    %c0_24 = arith.constant 0 : index
    %24 = vector.load %arg15[%c0_23, %c0_24] : memref<8x384xf32, #tpu.memory_space<vmem>>, vector<8x384xf32>
    %c0_i32_25 = arith.constant 0 : i32
    %cst_26 = arith.constant dense<0.000000e+00> : vector<8x384xf32>
    %25 = tpu.matmul %23, %12, %cst_26 {dimension_numbers = #tpu.dot_dimension_numbers<[1], [0], [0], [1], [0, 0, 1, 1], [], []>} : vector<8x128xf32>, vector<128x384xf32>, vector<8x384xf32> -> vector<8x384xf32>
    %c8_i32 = arith.constant 8 : i32
    %26 = arith.muli %c0_i32_25, %c8_i32 : i32
    %27 = tpu.assume_multiple %26, 8 : i32
    %28 = arith.index_cast %27 : i32 to index
    %c0_27 = arith.constant 0 : index
    %29 = vector.load %arg12[%28, %c0_27] : memref<32x384xf32, #tpu.memory_space<vmem>>, vector<8x384xf32>
    %30 = vector.extract_strided_slice %29 {offsets = [0, 0], sizes = [8, 128], strides = [1, 1]} : vector<8x384xf32> to vector<8x128xf32>
    %31 = vector.extract_strided_slice %24 {offsets = [0, 0], sizes = [8, 128], strides = [1, 1]} : vector<8x384xf32> to vector<8x128xf32>
    %32 = arith.addf %30, %31 : vector<8x128xf32>
    %33 = arith.negf %32 : vector<8x128xf32>
    %34 = math.exp %33 : vector<8x128xf32>
    %cst_28 = arith.constant 1.000000e+00 : f32
    %35 = vector.broadcast %cst_28 : f32 to vector<8x128xf32>
    %36 = arith.addf %35, %34 : vector<8x128xf32>
    %37 = arith.divf %35, %36 : vector<8x128xf32>
    %38 = vector.extract_strided_slice %29 {offsets = [0, 128], sizes = [8, 128], strides = [1, 1]} : vector<8x384xf32> to vector<8x128xf32>
    %39 = vector.extract_strided_slice %24 {offsets = [0, 128], sizes = [8, 128], strides = [1, 1]} : vector<8x384xf32> to vector<8x128xf32>
    %40 = arith.addf %38, %39 : vector<8x128xf32>
    %41 = arith.negf %40 : vector<8x128xf32>
    %42 = math.exp %41 : vector<8x128xf32>
    %cst_29 = arith.constant 1.000000e+00 : f32
    %43 = vector.broadcast %cst_29 : f32 to vector<8x128xf32>
    %44 = arith.addf %43, %42 : vector<8x128xf32>
    %45 = arith.divf %43, %44 : vector<8x128xf32>
    %46 = vector.extract_strided_slice %29 {offsets = [0, 256], sizes = [8, 128], strides = [1, 1]} : vector<8x384xf32> to vector<8x128xf32>
    %47 = vector.extract_strided_slice %24 {offsets = [0, 256], sizes = [8, 128], strides = [1, 1]} : vector<8x384xf32> to vector<8x128xf32>
    %48 = arith.addf %47, %18 : vector<8x128xf32>
    %49 = arith.mulf %37, %48 : vector<8x128xf32>
    %50 = arith.addf %46, %49 : vector<8x128xf32>
    %51 = math.tanh %50 : vector<8x128xf32>
    %cst_30 = arith.constant 1.000000e+00 : f32
    %52 = vector.broadcast %cst_30 : f32 to vector<8x128xf32>
    %53 = arith.subf %52, %45 : vector<8x128xf32>
    %54 = arith.mulf %53, %51 : vector<8x128xf32>
    %55 = arith.mulf %45, %22 : vector<8x128xf32>
    %56 = arith.addf %54, %55 : vector<8x128xf32>
    %cst_31 = arith.constant dense<0.000000e+00> : vector<8x768xf32>
    %57 = tpu.matmul %56, %11, %cst_31 {dimension_numbers = #tpu.dot_dimension_numbers<[1], [0], [0], [1], [0, 0, 1, 1], [], []>} : vector<8x128xf32>, vector<128x768xf32>, vector<8x768xf32> -> vector<8x768xf32>
    %58 = vector.extract_strided_slice %57 {offsets = [0, 0], sizes = [8, 384], strides = [1, 1]} : vector<8x768xf32> to vector<8x384xf32>
    %59 = arith.addf %58, %15 : vector<8x384xf32>
    %60 = vector.extract_strided_slice %57 {offsets = [0, 384], sizes = [8, 384], strides = [1, 1]} : vector<8x768xf32> to vector<8x384xf32>
    %61 = vector.extract_strided_slice %59 {offsets = [0, 0], sizes = [8, 128], strides = [1, 1]} : vector<8x384xf32> to vector<8x128xf32>
    %62 = vector.extract_strided_slice %25 {offsets = [0, 0], sizes = [8, 128], strides = [1, 1]} : vector<8x384xf32> to vector<8x128xf32>
    %63 = arith.addf %61, %62 : vector<8x128xf32>
    %64 = arith.negf %63 : vector<8x128xf32>
    %65 = math.exp %64 : vector<8x128xf32>
    %cst_32 = arith.constant 1.000000e+00 : f32
    %66 = vector.broadcast %cst_32 : f32 to vector<8x128xf32>
    %67 = arith.addf %66, %65 : vector<8x128xf32>
    %68 = arith.divf %66, %67 : vector<8x128xf32>
    %69 = vector.extract_strided_slice %59 {offsets = [0, 128], sizes = [8, 128], strides = [1, 1]} : vector<8x384xf32> to vector<8x128xf32>
    %70 = vector.extract_strided_slice %25 {offsets = [0, 128], sizes = [8, 128], strides = [1, 1]} : vector<8x384xf32> to vector<8x128xf32>
    %71 = arith.addf %69, %70 : vector<8x128xf32>
    %72 = arith.negf %71 : vector<8x128xf32>
    %73 = math.exp %72 : vector<8x128xf32>
    %cst_33 = arith.constant 1.000000e+00 : f32
    %74 = vector.broadcast %cst_33 : f32 to vector<8x128xf32>
    %75 = arith.addf %74, %73 : vector<8x128xf32>
    %76 = arith.divf %74, %75 : vector<8x128xf32>
    %77 = vector.extract_strided_slice %59 {offsets = [0, 256], sizes = [8, 128], strides = [1, 1]} : vector<8x384xf32> to vector<8x128xf32>
    %78 = vector.extract_strided_slice %25 {offsets = [0, 256], sizes = [8, 128], strides = [1, 1]} : vector<8x384xf32> to vector<8x128xf32>
    %79 = arith.addf %78, %21 : vector<8x128xf32>
    %80 = arith.mulf %68, %79 : vector<8x128xf32>
    %81 = arith.addf %77, %80 : vector<8x128xf32>
    %82 = math.tanh %81 : vector<8x128xf32>
    %cst_34 = arith.constant 1.000000e+00 : f32
    %83 = vector.broadcast %cst_34 : f32 to vector<8x128xf32>
    %84 = arith.subf %83, %76 : vector<8x128xf32>
    %85 = arith.mulf %84, %82 : vector<8x128xf32>
    %86 = arith.mulf %76, %23 : vector<8x128xf32>
    %87 = arith.addf %85, %86 : vector<8x128xf32>
    %88 = arith.index_cast %c0_i32_25 : i32 to index
    %c0_35 = arith.constant 0 : index
    %c0_36 = arith.constant 0 : index
    %89 = vector.load %arg10[%88, %c0_35, %c0_36] : memref<4x8x128xf32, #tpu.memory_space<vmem>>, vector<1x8x128xf32>
    %90 = vector.shape_cast %89 : vector<1x8x128xf32> to vector<8x128xf32>
    %91 = vector.shape_cast %87 : vector<8x128xf32> to vector<1x8x128xf32>
    tpu.vector_store %arg10[%88, %c0_35, %c0_36], %91 {strides = array<i32>} : memref<4x8x128xf32, #tpu.memory_space<vmem>>, vector<1x8x128xf32>,
    %c1_i32 = arith.constant 1 : i32
    %cst_37 = arith.constant dense<0.000000e+00> : vector<8x384xf32>
    %92 = tpu.matmul %87, %12, %cst_37 {dimension_numbers = #tpu.dot_dimension_numbers<[1], [0], [0], [1], [0, 0, 1, 1], [], []>} : vector<8x128xf32>, vector<128x384xf32>, vector<8x384xf32> -> vector<8x384xf32>
    %c8_i32_38 = arith.constant 8 : i32
    %93 = arith.muli %c1_i32, %c8_i32_38 : i32
    %94 = tpu.assume_multiple %93, 8 : i32
    %95 = arith.index_cast %94 : i32 to index
    %c0_39 = arith.constant 0 : index
    %96 = vector.load %arg12[%95, %c0_39] : memref<32x384xf32, #tpu.memory_space<vmem>>, vector<8x384xf32>
    %97 = vector.extract_strided_slice %96 {offsets = [0, 0], sizes = [8, 128], strides = [1, 1]} : vector<8x384xf32> to vector<8x128xf32>
    %98 = vector.extract_strided_slice %60 {offsets = [0, 0], sizes = [8, 128], strides = [1, 1]} : vector<8x384xf32> to vector<8x128xf32>
    %99 = arith.addf %97, %98 : vector<8x128xf32>
    %100 = arith.negf %99 : vector<8x128xf32>
    %101 = math.exp %100 : vector<8x128xf32>
    %cst_40 = arith.constant 1.000000e+00 : f32
    %102 = vector.broadcast %cst_40 : f32 to vector<8x128xf32>
    %103 = arith.addf %102, %101 : vector<8x128xf32>
    %104 = arith.divf %102, %103 : vector<8x128xf32>
    %105 = vector.extract_strided_slice %96 {offsets = [0, 128], sizes = [8, 128], strides = [1, 1]} : vector<8x384xf32> to vector<8x128xf32>
    %106 = vector.extract_strided_slice %60 {offsets = [0, 128], sizes = [8, 128], strides = [1, 1]} : vector<8x384xf32> to vector<8x128xf32>
    %107 = arith.addf %105, %106 : vector<8x128xf32>
    %108 = arith.negf %107 : vector<8x128xf32>
    %109 = math.exp %108 : vector<8x128xf32>
    %cst_41 = arith.constant 1.000000e+00 : f32
    %110 = vector.broadcast %cst_41 : f32 to vector<8x128xf32>
    %111 = arith.addf %110, %109 : vector<8x128xf32>
    %112 = arith.divf %110, %111 : vector<8x128xf32>
    %113 = vector.extract_strided_slice %96 {offsets = [0, 256], sizes = [8, 128], strides = [1, 1]} : vector<8x384xf32> to vector<8x128xf32>
    %114 = vector.extract_strided_slice %60 {offsets = [0, 256], sizes = [8, 128], strides = [1, 1]} : vector<8x384xf32> to vector<8x128xf32>
    %115 = arith.addf %114, %18 : vector<8x128xf32>
    %116 = arith.mulf %104, %115 : vector<8x128xf32>
    %117 = arith.addf %113, %116 : vector<8x128xf32>
    %118 = math.tanh %117 : vector<8x128xf32>
    %cst_42 = arith.constant 1.000000e+00 : f32
    %119 = vector.broadcast %cst_42 : f32 to vector<8x128xf32>
    %120 = arith.subf %119, %112 : vector<8x128xf32>
    %121 = arith.mulf %120, %118 : vector<8x128xf32>
    %122 = arith.mulf %112, %56 : vector<8x128xf32>
    %123 = arith.addf %121, %122 : vector<8x128xf32>
    %cst_43 = arith.constant dense<0.000000e+00> : vector<8x768xf32>
    %124 = tpu.matmul %123, %11, %cst_43 {dimension_numbers = #tpu.dot_dimension_numbers<[1], [0], [0], [1], [0, 0, 1, 1], [], []>} : vector<8x128xf32>, vector<128x768xf32>, vector<8x768xf32> -> vector<8x768xf32>
    %125 = vector.extract_strided_slice %124 {offsets = [0, 0], sizes = [8, 384], strides = [1, 1]} : vector<8x768xf32> to vector<8x384xf32>
    %126 = arith.addf %125, %15 : vector<8x384xf32>
    %127 = vector.extract_strided_slice %124 {offsets = [0, 384], sizes = [8, 384], strides = [1, 1]} : vector<8x768xf32> to vector<8x384xf32>
    %128 = vector.extract_strided_slice %126 {offsets = [0, 0], sizes = [8, 128], strides = [1, 1]} : vector<8x384xf32> to vector<8x128xf32>
    %129 = vector.extract_strided_slice %92 {offsets = [0, 0], sizes = [8, 128], strides = [1, 1]} : vector<8x384xf32> to vector<8x128xf32>
    %130 = arith.addf %128, %129 : vector<8x128xf32>
    %131 = arith.negf %130 : vector<8x128xf32>
    %132 = math.exp %131 : vector<8x128xf32>
    %cst_44 = arith.constant 1.000000e+00 : f32
    %133 = vector.broadcast %cst_44 : f32 to vector<8x128xf32>
    %134 = arith.addf %133, %132 : vector<8x128xf32>
    %135 = arith.divf %133, %134 : vector<8x128xf32>
    %136 = vector.extract_strided_slice %126 {offsets = [0, 128], sizes = [8, 128], strides = [1, 1]} : vector<8x384xf32> to vector<8x128xf32>
    %137 = vector.extract_strided_slice %92 {offsets = [0, 128], sizes = [8, 128], strides = [1, 1]} : vector<8x384xf32> to vector<8x128xf32>
    %138 = arith.addf %136, %137 : vector<8x128xf32>
    %139 = arith.negf %138 : vector<8x128xf32>
    %140 = math.exp %139 : vector<8x128xf32>
    %cst_45 = arith.constant 1.000000e+00 : f32
    %141 = vector.broadcast %cst_45 : f32 to vector<8x128xf32>
    %142 = arith.addf %141, %140 : vector<8x128xf32>
    %143 = arith.divf %141, %142 : vector<8x128xf32>
    %144 = vector.extract_strided_slice %126 {offsets = [0, 256], sizes = [8, 128], strides = [1, 1]} : vector<8x384xf32> to vector<8x128xf32>
    %145 = vector.extract_strided_slice %92 {offsets = [0, 256], sizes = [8, 128], strides = [1, 1]} : vector<8x384xf32> to vector<8x128xf32>
    %146 = arith.addf %145, %21 : vector<8x128xf32>
    %147 = arith.mulf %135, %146 : vector<8x128xf32>
    %148 = arith.addf %144, %147 : vector<8x128xf32>
    %149 = math.tanh %148 : vector<8x128xf32>
    %cst_46 = arith.constant 1.000000e+00 : f32
    %150 = vector.broadcast %cst_46 : f32 to vector<8x128xf32>
    %151 = arith.subf %150, %143 : vector<8x128xf32>
    %152 = arith.mulf %151, %149 : vector<8x128xf32>
    %153 = arith.mulf %143, %87 : vector<8x128xf32>
    %154 = arith.addf %152, %153 : vector<8x128xf32>
    %155 = arith.index_cast %c1_i32 : i32 to index
    %c0_47 = arith.constant 0 : index
    %c0_48 = arith.constant 0 : index
    %156 = vector.load %arg10[%155, %c0_47, %c0_48] : memref<4x8x128xf32, #tpu.memory_space<vmem>>, vector<1x8x128xf32>
    %157 = vector.shape_cast %156 : vector<1x8x128xf32> to vector<8x128xf32>
    %158 = vector.shape_cast %154 : vector<8x128xf32> to vector<1x8x128xf32>
    tpu.vector_store %arg10[%155, %c0_47, %c0_48], %158 {strides = array<i32>} : memref<4x8x128xf32, #tpu.memory_space<vmem>>, vector<1x8x128xf32>,
    %c2_i32 = arith.constant 2 : i32
    %cst_49 = arith.constant dense<0.000000e+00> : vector<8x384xf32>
    %159 = tpu.matmul %154, %12, %cst_49 {dimension_numbers = #tpu.dot_dimension_numbers<[1], [0], [0], [1], [0, 0, 1, 1], [], []>} : vector<8x128xf32>, vector<128x384xf32>, vector<8x384xf32> -> vector<8x384xf32>
    %c8_i32_50 = arith.constant 8 : i32
    %160 = arith.muli %c2_i32, %c8_i32_50 : i32
    %161 = tpu.assume_multiple %160, 8 : i32
    %162 = arith.index_cast %161 : i32 to index
    %c0_51 = arith.constant 0 : index
    %163 = vector.load %arg12[%162, %c0_51] : memref<32x384xf32, #tpu.memory_space<vmem>>, vector<8x384xf32>
    %164 = vector.extract_strided_slice %163 {offsets = [0, 0], sizes = [8, 128], strides = [1, 1]} : vector<8x384xf32> to vector<8x128xf32>
    %165 = vector.extract_strided_slice %127 {offsets = [0, 0], sizes = [8, 128], strides = [1, 1]} : vector<8x384xf32> to vector<8x128xf32>
    %166 = arith.addf %164, %165 : vector<8x128xf32>
    %167 = arith.negf %166 : vector<8x128xf32>
    %168 = math.exp %167 : vector<8x128xf32>
    %cst_52 = arith.constant 1.000000e+00 : f32
    %169 = vector.broadcast %cst_52 : f32 to vector<8x128xf32>
    %170 = arith.addf %169, %168 : vector<8x128xf32>
    %171 = arith.divf %169, %170 : vector<8x128xf32>
    %172 = vector.extract_strided_slice %163 {offsets = [0, 128], sizes = [8, 128], strides = [1, 1]} : vector<8x384xf32> to vector<8x128xf32>
    %173 = vector.extract_strided_slice %127 {offsets = [0, 128], sizes = [8, 128], strides = [1, 1]} : vector<8x384xf32> to vector<8x128xf32>
    %174 = arith.addf %172, %173 : vector<8x128xf32>
    %175 = arith.negf %174 : vector<8x128xf32>
    %176 = math.exp %175 : vector<8x128xf32>
    %cst_53 = arith.constant 1.000000e+00 : f32
    %177 = vector.broadcast %cst_53 : f32 to vector<8x128xf32>
    %178 = arith.addf %177, %176 : vector<8x128xf32>
    %179 = arith.divf %177, %178 : vector<8x128xf32>
    %180 = vector.extract_strided_slice %163 {offsets = [0, 256], sizes = [8, 128], strides = [1, 1]} : vector<8x384xf32> to vector<8x128xf32>
    %181 = vector.extract_strided_slice %127 {offsets = [0, 256], sizes = [8, 128], strides = [1, 1]} : vector<8x384xf32> to vector<8x128xf32>
    %182 = arith.addf %181, %18 : vector<8x128xf32>
    %183 = arith.mulf %171, %182 : vector<8x128xf32>
    %184 = arith.addf %180, %183 : vector<8x128xf32>
    %185 = math.tanh %184 : vector<8x128xf32>
    %cst_54 = arith.constant 1.000000e+00 : f32
    %186 = vector.broadcast %cst_54 : f32 to vector<8x128xf32>
    %187 = arith.subf %186, %179 : vector<8x128xf32>
    %188 = arith.mulf %187, %185 : vector<8x128xf32>
    %189 = arith.mulf %179, %123 : vector<8x128xf32>
    %190 = arith.addf %188, %189 : vector<8x128xf32>
    %cst_55 = arith.constant dense<0.000000e+00> : vector<8x768xf32>
    %191 = tpu.matmul %190, %11, %cst_55 {dimension_numbers = #tpu.dot_dimension_numbers<[1], [0], [0], [1], [0, 0, 1, 1], [], []>} : vector<8x128xf32>, vector<128x768xf32>, vector<8x768xf32> -> vector<8x768xf32>
    %192 = vector.extract_strided_slice %191 {offsets = [0, 0], sizes = [8, 384], strides = [1, 1]} : vector<8x768xf32> to vector<8x384xf32>
    %193 = arith.addf %192, %15 : vector<8x384xf32>
    %194 = vector.extract_strided_slice %191 {offsets = [0, 384], sizes = [8, 384], strides = [1, 1]} : vector<8x768xf32> to vector<8x384xf32>
    %195 = vector.extract_strided_slice %193 {offsets = [0, 0], sizes = [8, 128], strides = [1, 1]} : vector<8x384xf32> to vector<8x128xf32>
    %196 = vector.extract_strided_slice %159 {offsets = [0, 0], sizes = [8, 128], strides = [1, 1]} : vector<8x384xf32> to vector<8x128xf32>
    %197 = arith.addf %195, %196 : vector<8x128xf32>
    %198 = arith.negf %197 : vector<8x128xf32>
    %199 = math.exp %198 : vector<8x128xf32>
    %cst_56 = arith.constant 1.000000e+00 : f32
    %200 = vector.broadcast %cst_56 : f32 to vector<8x128xf32>
    %201 = arith.addf %200, %199 : vector<8x128xf32>
    %202 = arith.divf %200, %201 : vector<8x128xf32>
    %203 = vector.extract_strided_slice %193 {offsets = [0, 128], sizes = [8, 128], strides = [1, 1]} : vector<8x384xf32> to vector<8x128xf32>
    %204 = vector.extract_strided_slice %159 {offsets = [0, 128], sizes = [8, 128], strides = [1, 1]} : vector<8x384xf32> to vector<8x128xf32>
    %205 = arith.addf %203, %204 : vector<8x128xf32>
    %206 = arith.negf %205 : vector<8x128xf32>
    %207 = math.exp %206 : vector<8x128xf32>
    %cst_57 = arith.constant 1.000000e+00 : f32
    %208 = vector.broadcast %cst_57 : f32 to vector<8x128xf32>
    %209 = arith.addf %208, %207 : vector<8x128xf32>
    %210 = arith.divf %208, %209 : vector<8x128xf32>
    %211 = vector.extract_strided_slice %193 {offsets = [0, 256], sizes = [8, 128], strides = [1, 1]} : vector<8x384xf32> to vector<8x128xf32>
    %212 = vector.extract_strided_slice %159 {offsets = [0, 256], sizes = [8, 128], strides = [1, 1]} : vector<8x384xf32> to vector<8x128xf32>
    %213 = arith.addf %212, %21 : vector<8x128xf32>
    %214 = arith.mulf %202, %213 : vector<8x128xf32>
    %215 = arith.addf %211, %214 : vector<8x128xf32>
    %216 = math.tanh %215 : vector<8x128xf32>
    %cst_58 = arith.constant 1.000000e+00 : f32
    %217 = vector.broadcast %cst_58 : f32 to vector<8x128xf32>
    %218 = arith.subf %217, %210 : vector<8x128xf32>
    %219 = arith.mulf %218, %216 : vector<8x128xf32>
    %220 = arith.mulf %210, %154 : vector<8x128xf32>
    %221 = arith.addf %219, %220 : vector<8x128xf32>
    %222 = arith.index_cast %c2_i32 : i32 to index
    %c0_59 = arith.constant 0 : index
    %c0_60 = arith.constant 0 : index
    %223 = vector.load %arg10[%222, %c0_59, %c0_60] : memref<4x8x128xf32, #tpu.memory_space<vmem>>, vector<1x8x128xf32>
    %224 = vector.shape_cast %223 : vector<1x8x128xf32> to vector<8x128xf32>
    %225 = vector.shape_cast %221 : vector<8x128xf32> to vector<1x8x128xf32>
    tpu.vector_store %arg10[%222, %c0_59, %c0_60], %225 {strides = array<i32>} : memref<4x8x128xf32, #tpu.memory_space<vmem>>, vector<1x8x128xf32>,
    %c3_i32 = arith.constant 3 : i32
    %cst_61 = arith.constant dense<0.000000e+00> : vector<8x384xf32>
    %226 = tpu.matmul %221, %12, %cst_61 {dimension_numbers = #tpu.dot_dimension_numbers<[1], [0], [0], [1], [0, 0, 1, 1], [], []>} : vector<8x128xf32>, vector<128x384xf32>, vector<8x384xf32> -> vector<8x384xf32>
    %c8_i32_62 = arith.constant 8 : i32
    %227 = arith.muli %c3_i32, %c8_i32_62 : i32
    %228 = tpu.assume_multiple %227, 8 : i32
    %229 = arith.index_cast %228 : i32 to index
    %c0_63 = arith.constant 0 : index
    %230 = vector.load %arg12[%229, %c0_63] : memref<32x384xf32, #tpu.memory_space<vmem>>, vector<8x384xf32>
    %231 = vector.extract_strided_slice %230 {offsets = [0, 0], sizes = [8, 128], strides = [1, 1]} : vector<8x384xf32> to vector<8x128xf32>
    %232 = vector.extract_strided_slice %194 {offsets = [0, 0], sizes = [8, 128], strides = [1, 1]} : vector<8x384xf32> to vector<8x128xf32>
    %233 = arith.addf %231, %232 : vector<8x128xf32>
    %234 = arith.negf %233 : vector<8x128xf32>
    %235 = math.exp %234 : vector<8x128xf32>
    %cst_64 = arith.constant 1.000000e+00 : f32
    %236 = vector.broadcast %cst_64 : f32 to vector<8x128xf32>
    %237 = arith.addf %236, %235 : vector<8x128xf32>
    %238 = arith.divf %236, %237 : vector<8x128xf32>
    %239 = vector.extract_strided_slice %230 {offsets = [0, 128], sizes = [8, 128], strides = [1, 1]} : vector<8x384xf32> to vector<8x128xf32>
    %240 = vector.extract_strided_slice %194 {offsets = [0, 128], sizes = [8, 128], strides = [1, 1]} : vector<8x384xf32> to vector<8x128xf32>
    %241 = arith.addf %239, %240 : vector<8x128xf32>
    %242 = arith.negf %241 : vector<8x128xf32>
    %243 = math.exp %242 : vector<8x128xf32>
    %cst_65 = arith.constant 1.000000e+00 : f32
    %244 = vector.broadcast %cst_65 : f32 to vector<8x128xf32>
    %245 = arith.addf %244, %243 : vector<8x128xf32>
    %246 = arith.divf %244, %245 : vector<8x128xf32>
    %247 = vector.extract_strided_slice %230 {offsets = [0, 256], sizes = [8, 128], strides = [1, 1]} : vector<8x384xf32> to vector<8x128xf32>
    %248 = vector.extract_strided_slice %194 {offsets = [0, 256], sizes = [8, 128], strides = [1, 1]} : vector<8x384xf32> to vector<8x128xf32>
    %249 = arith.addf %248, %18 : vector<8x128xf32>
    %250 = arith.mulf %238, %249 : vector<8x128xf32>
    %251 = arith.addf %247, %250 : vector<8x128xf32>
    %252 = math.tanh %251 : vector<8x128xf32>
    %cst_66 = arith.constant 1.000000e+00 : f32
    %253 = vector.broadcast %cst_66 : f32 to vector<8x128xf32>
    %254 = arith.subf %253, %246 : vector<8x128xf32>
    %255 = arith.mulf %254, %252 : vector<8x128xf32>
    %256 = arith.mulf %246, %190 : vector<8x128xf32>
    %257 = arith.addf %255, %256 : vector<8x128xf32>
    %cst_67 = arith.constant dense<0.000000e+00> : vector<8x768xf32>
    %258 = tpu.matmul %257, %11, %cst_67 {dimension_numbers = #tpu.dot_dimension_numbers<[1], [0], [0], [1], [0, 0, 1, 1], [], []>} : vector<8x128xf32>, vector<128x768xf32>, vector<8x768xf32> -> vector<8x768xf32>
    %259 = vector.extract_strided_slice %258 {offsets = [0, 0], sizes = [8, 384], strides = [1, 1]} : vector<8x768xf32> to vector<8x384xf32>
    %260 = arith.addf %259, %15 : vector<8x384xf32>
    %261 = vector.extract_strided_slice %258 {offsets = [0, 384], sizes = [8, 384], strides = [1, 1]} : vector<8x768xf32> to vector<8x384xf32>
    %262 = vector.extract_strided_slice %260 {offsets = [0, 0], sizes = [8, 128], strides = [1, 1]} : vector<8x384xf32> to vector<8x128xf32>
    %263 = vector.extract_strided_slice %226 {offsets = [0, 0], sizes = [8, 128], strides = [1, 1]} : vector<8x384xf32> to vector<8x128xf32>
    %264 = arith.addf %262, %263 : vector<8x128xf32>
    %265 = arith.negf %264 : vector<8x128xf32>
    %266 = math.exp %265 : vector<8x128xf32>
    %cst_68 = arith.constant 1.000000e+00 : f32
    %267 = vector.broadcast %cst_68 : f32 to vector<8x128xf32>
    %268 = arith.addf %267, %266 : vector<8x128xf32>
    %269 = arith.divf %267, %268 : vector<8x128xf32>
    %270 = vector.extract_strided_slice %260 {offsets = [0, 128], sizes = [8, 128], strides = [1, 1]} : vector<8x384xf32> to vector<8x128xf32>
    %271 = vector.extract_strided_slice %226 {offsets = [0, 128], sizes = [8, 128], strides = [1, 1]} : vector<8x384xf32> to vector<8x128xf32>
    %272 = arith.addf %270, %271 : vector<8x128xf32>
    %273 = arith.negf %272 : vector<8x128xf32>
    %274 = math.exp %273 : vector<8x128xf32>
    %cst_69 = arith.constant 1.000000e+00 : f32
    %275 = vector.broadcast %cst_69 : f32 to vector<8x128xf32>
    %276 = arith.addf %275, %274 : vector<8x128xf32>
    %277 = arith.divf %275, %276 : vector<8x128xf32>
    %278 = vector.extract_strided_slice %260 {offsets = [0, 256], sizes = [8, 128], strides = [1, 1]} : vector<8x384xf32> to vector<8x128xf32>
    %279 = vector.extract_strided_slice %226 {offsets = [0, 256], sizes = [8, 128], strides = [1, 1]} : vector<8x384xf32> to vector<8x128xf32>
    %280 = arith.addf %279, %21 : vector<8x128xf32>
    %281 = arith.mulf %269, %280 : vector<8x128xf32>
    %282 = arith.addf %278, %281 : vector<8x128xf32>
    %283 = math.tanh %282 : vector<8x128xf32>
    %cst_70 = arith.constant 1.000000e+00 : f32
    %284 = vector.broadcast %cst_70 : f32 to vector<8x128xf32>
    %285 = arith.subf %284, %277 : vector<8x128xf32>
    %286 = arith.mulf %285, %283 : vector<8x128xf32>
    %287 = arith.mulf %277, %221 : vector<8x128xf32>
    %288 = arith.addf %286, %287 : vector<8x128xf32>
    %289 = arith.index_cast %c3_i32 : i32 to index
    %c0_71 = arith.constant 0 : index
    %c0_72 = arith.constant 0 : index
    %290 = vector.load %arg10[%289, %c0_71, %c0_72] : memref<4x8x128xf32, #tpu.memory_space<vmem>>, vector<1x8x128xf32>
    %291 = vector.shape_cast %290 : vector<1x8x128xf32> to vector<8x128xf32>
    %292 = vector.shape_cast %288 : vector<8x128xf32> to vector<1x8x128xf32>
    tpu.vector_store %arg10[%289, %c0_71, %c0_72], %292 {strides = array<i32>} : memref<4x8x128xf32, #tpu.memory_space<vmem>>, vector<1x8x128xf32>,
    %c4_i32 = arith.constant 4 : i32
    %c0_73 = arith.constant 0 : index
    %c0_74 = arith.constant 0 : index
    %293 = vector.load %arg13[%c0_73, %c0_74] : memref<8x128xf32, #tpu.memory_space<vmem>>, vector<8x128xf32>
    tpu.vector_store %arg13[%c0_73, %c0_74], %257 {strides = array<i32>} : memref<8x128xf32, #tpu.memory_space<vmem>>, vector<8x128xf32>,
    %c0_75 = arith.constant 0 : index
    %c0_76 = arith.constant 0 : index
    %294 = vector.load %arg14[%c0_75, %c0_76] : memref<8x128xf32, #tpu.memory_space<vmem>>, vector<8x128xf32>
    tpu.vector_store %arg14[%c0_75, %c0_76], %288 {strides = array<i32>} : memref<8x128xf32, #tpu.memory_space<vmem>>, vector<8x128xf32>,
    %c0_77 = arith.constant 0 : index
    %c0_78 = arith.constant 0 : index
    %295 = vector.load %arg15[%c0_77, %c0_78] : memref<8x384xf32, #tpu.memory_space<vmem>>, vector<8x384xf32>
    tpu.vector_store %arg15[%c0_77, %c0_78], %261 {strides = array<i32>} : memref<8x384xf32, #tpu.memory_space<vmem>>, vector<8x384xf32>,
    %c1_i32_79 = arith.constant 1 : i32
    %296 = arith.cmpi eq, %arg1, %c1_i32_79 : i32
    %297 = arith.extui %296 : i1 to i32
    %c0_i32_80 = arith.constant 0 : i32
    %298 = arith.cmpi ne, %297, %c0_i32_80 : i32
    scf.if %298 {
      %c0_81 = arith.constant 0 : index
      %c0_82 = arith.constant 0 : index
      %c0_83 = arith.constant 0 : index
      %299 = vector.load %arg11[%c0_81, %c0_82, %c0_83] : memref<2x8x128xf32, #tpu.memory_space<vmem>>, vector<1x8x128xf32>
      %300 = vector.shape_cast %299 : vector<1x8x128xf32> to vector<8x128xf32>
      %301 = vector.shape_cast %257 : vector<8x128xf32> to vector<1x8x128xf32>
      tpu.vector_store %arg11[%c0_81, %c0_82, %c0_83], %301 {strides = array<i32>} : memref<2x8x128xf32, #tpu.memory_space<vmem>>, vector<1x8x128xf32>,
      %c1 = arith.constant 1 : index
      %c0_84 = arith.constant 0 : index
      %c0_85 = arith.constant 0 : index
      %302 = vector.load %arg11[%c1, %c0_84, %c0_85] : memref<2x8x128xf32, #tpu.memory_space<vmem>>, vector<1x8x128xf32>
      %303 = vector.shape_cast %302 : vector<1x8x128xf32> to vector<8x128xf32>
      %304 = vector.shape_cast %288 : vector<8x128xf32> to vector<1x8x128xf32>
      tpu.vector_store %arg11[%c1, %c0_84, %c0_85], %304 {strides = array<i32>} : memref<2x8x128xf32, #tpu.memory_space<vmem>>, vector<1x8x128xf32>,
    } else {
    }
    return
  }
  func.func @transform_0(%arg0: i32, %arg1: i32) -> (i32, i32, i32) {
    %c0_i32 = arith.constant 0 : i32
    %c0_i32_0 = arith.constant 0 : i32
    return %arg1, %arg0, %c0_i32 : i32, i32, i32
  }
  func.func @transform_1(%arg0: i32, %arg1: i32) -> (i32, i32) {
    %c0_i32 = arith.constant 0 : i32
    %c0_i32_0 = arith.constant 0 : i32
    %c0_i32_1 = arith.constant 0 : i32
    return %c0_i32, %c0_i32_0 : i32, i32
  }
  func.func @transform_2(%arg0: i32, %arg1: i32) -> (i32, i32) {
    %c0_i32 = arith.constant 0 : i32
    %c0_i32_0 = arith.constant 0 : i32
    %c0_i32_1 = arith.constant 0 : i32
    return %c0_i32, %c0_i32_0 : i32, i32
  }
  func.func @transform_3(%arg0: i32, %arg1: i32) -> (i32, i32) {
    %c0_i32 = arith.constant 0 : i32
    %c0_i32_0 = arith.constant 0 : i32
    %c0_i32_1 = arith.constant 0 : i32
    return %c0_i32, %c0_i32_0 : i32, i32
  }
  func.func @transform_4(%arg0: i32, %arg1: i32) -> (i32, i32) {
    %c0_i32 = arith.constant 0 : i32
    %c0_i32_0 = arith.constant 0 : i32
    %c0_i32_1 = arith.constant 0 : i32
    return %c0_i32, %c0_i32_0 : i32, i32
  }
  func.func @transform_5(%arg0: i32, %arg1: i32) -> (i32, i32) {
    %c0_i32 = arith.constant 0 : i32
    %c0_i32_0 = arith.constant 0 : i32
    %c0_i32_1 = arith.constant 0 : i32
    return %c0_i32, %c0_i32_0 : i32, i32
  }
  func.func @transform_6(%arg0: i32, %arg1: i32) -> (i32, i32) {
    %c0_i32 = arith.constant 0 : i32
    %c0_i32_0 = arith.constant 0 : i32
    %c0_i32_1 = arith.constant 0 : i32
    return %c0_i32, %c0_i32_0 : i32, i32
  }
  func.func @transform_7(%arg0: i32, %arg1: i32) -> (i32, i32) {
    %c0_i32 = arith.constant 0 : i32
    %c0_i32_0 = arith.constant 0 : i32
    %c0_i32_1 = arith.constant 0 : i32
    return %c0_i32, %c0_i32_0 : i32, i32
  }
  func.func @transform_8(%arg0: i32, %arg1: i32) -> (i32, i32, i32) {
    %c0_i32 = arith.constant 0 : i32
    %c0_i32_0 = arith.constant 0 : i32
    return %arg1, %arg0, %c0_i32 : i32, i32, i32
  }
  func.func @transform_9(%arg0: i32, %arg1: i32) -> (i32, i32, i32) {
    %c0_i32 = arith.constant 0 : i32
    %c0_i32_0 = arith.constant 0 : i32
    %c0_i32_1 = arith.constant 0 : i32
    return %c0_i32, %arg0, %c0_i32_0 : i32, i32, i32
  }
}

</mosaic_0001>

<bundles_post_ra>
// kernel: encoder_forward.1
= control target key start
LH: loop header
LB: loop body
LE: loop exit
PB: predicated region body
PF: predicated region fallthrough
CT: control target
= control target key end

     0   :  { %s3754_s30 = smov 0   ;;  %s3756_s10 = smov 0   ;;  %s5034_s0 = inlined_call_operand.vmem [shape: f32[8,8,128], index: 0, kind: input, shape index: {}]   ;;  %s5035_s1 = inlined_call_operand.vmem [shape: f32[128,384], index: 1, kind: input, shape index: {}]   ;;  %s5036_s2 = inlined_call_operand.vmem [shape: f32[1,384], index: 2, kind: input, shape index: {}]   ;;  %s5037_s3 = inlined_call_operand.vmem [shape: f32[128,768], index: 3, kind: input, shape index: {}]   ;;  %s5038_s4 = inlined_call_operand.vmem [shape: f32[128,384], index: 4, kind: input, shape index: {}]   ;;  %s5039_s5 = inlined_call_operand.vmem [shape: f32[1,384], index: 5, kind: input, shape index: {}]   ;;  %s5040_s6 = inlined_call_operand.vmem [shape: f32[1,128], index: 6, kind: input, shape index: {}]   ;;  %s5041_s7 = inlined_call_operand.vmem [shape: f32[1,128], index: 7, kind: input, shape index: {}]   ;;  %s5042_s8 = inlined_call_operand.vmem [shape: f32[8,8,128], index: 8, kind: output, shape index: {0}]   ;;  %s5043_s9 = inlined_call_operand.vmem [shape: f32[2,8,128], index: 9, kind: output, shape index: {1}]  }
   0x1   :  { %s3758_s11 = smov 0  }
   0x2 LB: > { %s29_s12 = sadd.s32 1, %s3694_s10  ;;  %p2582_p0 = scmp.ge.s32.totalorder %s3698_s11, 1  ;;  %s3698_s11 = sphi %s3758_s11, %s20_s11   ;;  %s3694_s10 = sphi %s3756_s10, %s5322_s10   ;;  %s3690_s30 = sphi %s3754_s30, %s5321_s30  }
   0x3   : > { %p30_p1 = scmp.ge.s32.totalorder %s29_s12, 2  ;;  %p310_p2 = scmp.lt.s32.totalorder %s3698_s11, 3 }
   0x5   : > { %s5324_s12 = smov (%p30_p1, %s29_s12), 0  ;;  %p311_p3 = pnand %p2582_p0, %p310_p2 }
   0x7   : > { %314 = sbr.rel (%p311_p3) target bundleno = 1453 (0x5ad), region = 52 }
   0xe   : > { %s2583_s13 = sshll.u32 %s3690_s30, 2  ;;  %p2587_p5 = scmp.ne.s32.totalorder %s3690_s30, 0 }
   0xf   : > { %p357_p4 = scmp.lt.s32.totalorder %s2583_s13, 7  ;;  %v3700_v0 = vmov (!%p2587_p5), 0.0  }
  0x10   : > { %381 = sbr.rel (%p2587_p5) target bundleno = 23 (0x17), region = 56  ;;  %382 = vst [vmem:[#allocation3] sm:$0xff] (!%p2587_p5), %v3700_v0  ;;  %383 = vst [vmem:[#allocation4] sm:$0xff] (!%p2587_p5), %v3700_v0 }
  0x11   : > { %s5326_s13 = smov (!%p357_p4, %s2583_s13), 7  ;;  %384 = vst [vmem:[#allocation5] sm:$0xff] (!%p2587_p5), %v3700_v0  ;;  %385 = vst [vmem:[#allocation5 + $0x8] sm:$0xff] (!%p2587_p5), %v3700_v0 }
  0x12   : > { %s2584_s14 = sshll.u32 %s5326_s13, 3  ;;  %386 = vst [vmem:[#allocation5 + $0x10] sm:$0xff] (!%p2587_p5), %v3700_v0 }
  0x13   : > { %s3778_s17 = scalar_lea.vmem %s5034_s0, %s2584_s14  ;;  %s3783_s20 = scalar_lea.vmem %s5042_s8, %s2584_s14 }
  0x17 PF: > { %v392_v1 = vld [vmem:[%s5035_s1 + $0x8] sm:$0xff]  ;;  %v395_v2 = vld [vmem:[%s5035_s1 + $0x20] sm:$0xff]  ;;  %v394_v5 = vld [vmem:[%s5035_s1 + $0x18] sm:$0xff]  ;;  %v5046_v8 = vmov 0.0   ;;  %vm3703_vm0 = vmmov 0   ;;  %p2609_p6 = scmp.ne.s32.totalorder %s3690_s30, 1 }
  0x18   : > { %v391_v3 = vld [vmem:[%s5035_s1] sm:$0xff]  ;;  %v2880_v4 = vpack.c.bf16 %v395_v2, %v392_v1  ;;  %v398_v6 = vld [vmem:[%s5035_s1 + $0x38] sm:$0xff]  ;;  %v401_v7 = vld [vmem:[%s5035_s1 + $0x50] sm:$0xff]  ;;  %520 = vmatprep.mubr.f32.mxu0 %v5046_v8 }
  0x19   : > { %v2882_v9 = vpack.c.bf16 %v394_v5, %v391_v3  ;;  %v2884_v10 = vpack.c.bf16 %v401_v7, %v398_v6  ;;  %v397_v11 = vld [vmem:[%s5035_s1 + $0x30] sm:$0xff]  ;;  %v400_v12 = vld [vmem:[%s5035_s1 + $0x48] sm:$0xff]  ;;  %v407_v14 = vld [vmem:[%s5035_s1 + $0x80] sm:$0xff] }
  0x1a   : > { %v404_v13 = vld [vmem:[%s5035_s1 + $0x68] sm:$0xff]  ;;  %2881 = vmatprep.subr.bf16.mxu0 %v2880_v4  ;;  %v2886_v15 = vpack.c.bf16 %v400_v12, %v397_v11  ;;  %v403_v17 = vld [vmem:[%s5035_s1 + $0x60] sm:$0xff]  ;;  %v406_v18 = vld [vmem:[%s5035_s1 + $0x78] sm:$0xff] }
  0x1b   : > { %2883 = vmatpush1.bf16.msra.mxu0 %v2882_v9  ;;  %v2888_v16 = vpack.c.bf16 %v407_v14, %v404_v13  ;;  %v410_v19 = vld [vmem:[%s5035_s1 + $0x98] sm:$0xff]  ;;  %v413_v20 = vld [vmem:[%s5035_s1 + $0xb0] sm:$0xff]  ;;  %v2890_v21 = vpack.c.bf16 %v406_v18, %v403_v17  ;;  %v412_v24 = vld [vmem:[%s5035_s1 + $0xa8] sm:$0xff] }
  0x1c   : > { %2885 = vmatprep.subr.bf16.mxu0 %v2884_v10  ;;  %v2892_v22 = vpack.c.bf16 %v413_v20, %v410_v19  ;;  %v409_v23 = vld [vmem:[%s5035_s1 + $0x90] sm:$0xff]  ;;  %v416_v25 = vld [vmem:[%s5035_s1 + $0xc8] sm:$0xff]  ;;  %v419_v26 = vld [vmem:[%s5035_s1 + $0xe0] sm:$0xff] }
  0x1d   : > { %v393_v27 = vld [vmem:[%s5035_s1 + $0x10] sm:$0xff]  ;;  %v396_v28 = vld [vmem:[%s5035_s1 + $0x28] sm:$0xff]  ;;  %v3848_v30 = vld [vmem:[%s3778_s17] sm:$0xff]  ;;  %v2894_v32 = vpack.c.bf16 %v412_v24, %v409_v23  ;;  %v2896_v36 = vpack.c.bf16 %v419_v26, %v416_v25 }
  0x1e   : > { %v2912_v29 = vpack.c.bf16 %v396_v28, %v393_v27  ;;  %v399_v31 = vld [vmem:[%s5035_s1 + $0x40] sm:$0xff]  ;;  %v402_v33 = vld [vmem:[%s5035_s1 + $0x58] sm:$0xff]  ;;  %v405_v34 = vld [vmem:[%s5035_s1 + $0x70] sm:$0xff]  ;;  %2734 = vmatprep.mubr.f32.mxu1 %v3848_v30 }
  0x1f   : > { %2887 = vmatpush1.bf16.msra.mxu0 %v2886_v15  ;;  %v408_v35 = vld [vmem:[%s5035_s1 + $0x88] sm:$0xff]  ;;  %v415_v37 = vld [vmem:[%s5035_s1 + $0xc0] sm:$0xff]  ;;  %v418_v38 = vld [vmem:[%s5035_s1 + $0xd8] sm:$0xff]  ;;  %v2916_v39 = vpack.c.bf16 %v402_v33, %v399_v31 }
  0x20   : > { %2889 = vmatprep.subr.bf16.mxu0 %v2888_v16  ;;  %2913 = vmatprep.subr.bf16.mxu1 %v2912_v29  ;;  %v422_v40 = vld [vmem:[%s5035_s1 + $0xf8] sm:$0xff]  ;;  %v425_v41 = vld [vmem:[%s5035_s1 + $0x110] sm:$0xff]  ;;  %v2920_v42 = vpack.c.bf16 %v408_v35, %v405_v34  ;;  %v2898_v43 = vpack.c.bf16 %v418_v38, %v415_v37  ;;  %v411_v44 = vld [vmem:[%s5035_s1 + $0xa0] sm:$0xff] }
  0x21   : > { %2915 = vmatpush3.bf16.msra.mxu1 %v2912_v29  ;;  %v414_v45 = vld [vmem:[%s5035_s1 + $0xb8] sm:$0xff]  ;;  %v2900_v46 = vpack.c.bf16 %v425_v41, %v422_v40  ;;  %v421_v47 = vld [vmem:[%s5035_s1 + $0xf0] sm:$0xff]  ;;  %v424_v48 = vld [vmem:[%s5035_s1 + $0x108] sm:$0xff] }
  0x22   : > { %2917 = vmatprep.subr.bf16.mxu1 %v2916_v39  ;;  %v428_v49 = vld [vmem:[%s5035_s1 + $0x128] sm:$0xff]  ;;  %v431_v50 = vld [vmem:[%s5035_s1 + $0x140] sm:$0xff]  ;;  %v2924_v51 = vpack.c.bf16 %v414_v45, %v411_v44  ;;  %v2902_v52 = vpack.c.bf16 %v424_v48, %v421_v47  ;;  %v417_v53 = vld [vmem:[%s5035_s1 + $0xd0] sm:$0xff] }
  0x23   : > { %2891 = vmatpush1.bf16.msra.mxu0 %v2890_v21  ;;  %v420_v54 = vld [vmem:[%s5035_s1 + $0xe8] sm:$0xff]  ;;  %v2904_v55 = vpack.c.bf16 %v431_v50, %v428_v49  ;;  %v427_v56 = vld [vmem:[%s5035_s1 + $0x120] sm:$0xff]  ;;  %v430_v57 = vld [vmem:[%s5035_s1 + $0x138] sm:$0xff] }
  0x24   : > { %2893 = vmatprep.subr.bf16.mxu0 %v2892_v22  ;;  %v434_v58 = vld [vmem:[%s5035_s1 + $0x158] sm:$0xff]  ;;  %v437_v59 = vld [vmem:[%s5035_s1 + $0x170] sm:$0xff]  ;;  %v2928_v60 = vpack.c.bf16 %v420_v54, %v417_v53  ;;  %v2906_v61 = vpack.c.bf16 %v430_v57, %v427_v56  ;;  %v423_v62 = vld [vmem:[%s5035_s1 + $0x100] sm:$0xff] }
  0x25   : > { %2919 = vmatpush3.bf16.msra.mxu1 %v2916_v39  ;;  %v426_v63 = vld [vmem:[%s5035_s1 + $0x118] sm:$0xff]  ;;  %v2908_v0 = vpack.c.bf16 %v437_v59, %v434_v58  ;;  %v433_v1 = vld [vmem:[%s5035_s1 + $0x150] sm:$0xff]  ;;  %v436_v2 = vld [vmem:[%s5035_s1 + $0x168] sm:$0xff]  ;;  %v5044_v39 = vmov 0.0|0.0  }
  0x26   : > { %2921 = vmatprep.subr.bf16.mxu1 %v2920_v42  ;;  %v739_v3 = vld [vmem:[%s5038_s4 + $0x8] sm:$0xff]  ;;  %v742_v4 = vld [vmem:[%s5038_s4 + $0x20] sm:$0xff]  ;;  %v2932_v5 = vpack.c.bf16 %v426_v63, %v423_v62  ;;  %v2910_v6 = vpack.c.bf16 %v436_v2, %v433_v1  ;;  %v429_v7 = vld [vmem:[%s5035_s1 + $0x130] sm:$0xff] }
  0x27   : > { %2895 = vmatpush1.bf16.msra.mxu0 %v2894_v32  ;;  %v432_v9 = vld [vmem:[%s5035_s1 + $0x148] sm:$0xff]  ;;  %v3935_v10 = vpack.c.bf16 %v742_v4, %v739_v3  ;;  %v738_v11 = vld [vmem:[%s5038_s4] sm:$0xff]  ;;  %v741_v12 = vld [vmem:[%s5038_s4 + $0x18] sm:$0xff] }
  0x28   : > { %2897 = vmatprep.subr.bf16.mxu0 %v2896_v36  ;;  %v745_v13 = vld [vmem:[%s5038_s4 + $0x38] sm:$0xff]  ;;  %v748_v14 = vld [vmem:[%s5038_s4 + $0x50] sm:$0xff]  ;;  %v2936_v15 = vpack.c.bf16 %v432_v9, %v429_v7  ;;  %v435_v16 = vld [vmem:[%s5035_s1 + $0x160] sm:$0xff]  ;;  %v3955_v18 = vpack.c.bf16 %v741_v12, %v738_v11 }
  0x29   : > { %2923 = vmatpush3.bf16.msra.mxu1 %v2920_v42  ;;  %5158 = vst [vmem:[#allocation6_spill] sm:$0xff] %v3935_v10  ;;  %v438_v17 = vld [vmem:[%s5035_s1 + $0x178] sm:$0xff]  ;;  %v3958_v19 = vpack.c.bf16 %v748_v14, %v745_v13  ;;  %v744_v20 = vld [vmem:[%s5038_s4 + $0x30] sm:$0xff]  ;;  %v747_v21 = vld [vmem:[%s5038_s4 + $0x48] sm:$0xff] }
  0x2a   : > { %2925 = vmatprep.subr.bf16.mxu1 %v2924_v51  ;;  %5159 = vst [vmem:[#allocation7_spill] sm:$0xff] %v3955_v18  ;;  %v751_v22 = vld [vmem:[%s5038_s4 + $0x68] sm:$0xff]  ;;  %v754_v23 = vld [vmem:[%s5038_s4 + $0x80] sm:$0xff]  ;;  %v2940_v24 = vpack.c.bf16 %v438_v17, %v435_v16  ;;  %v3974_v25 = vpack.c.bf16 %v747_v21, %v744_v20  ;;  %v753_v28 = vld [vmem:[%s5038_s4 + $0x78] sm:$0xff] }
  0x2b   : > { %2899 = vmatpush1.bf16.msra.mxu0 %v2898_v43  ;;  %5160 = vst [vmem:[#allocation8_spill] sm:$0xff] %v3958_v19  ;;  %v3978_v26 = vpack.c.bf16 %v754_v23, %v751_v22  ;;  %v750_v27 = vld [vmem:[%s5038_s4 + $0x60] sm:$0xff]  ;;  %v388_v29 = vld [vmem:[%s3778_s17 + $0x8] sm:$0xff]  ;;  %v760_v31 = vld [vmem:[%s5038_s4 + $0xb0] sm:$0xff] }
  0x2c   : > { %2901 = vmatprep.subr.bf16.mxu0 %v2900_v46  ;;  %v740_v32 = vld [vmem:[%s5038_s4 + $0x10] sm:$0xff]  ;;  %v743_v33 = vld [vmem:[%s5038_s4 + $0x28] sm:$0xff]  ;;  %v4000_v34 = vpack.c.bf16 %v753_v28, %v750_v27  ;;  %v746_v40 = vld [vmem:[%s5038_s4 + $0x40] sm:$0xff] }
  0x2d   : > { %2927 = vmatpush3.bf16.msra.mxu1 %v2924_v51  ;;  %5161 = vst [vmem:[#allocation9_spill] sm:$0xff] %v3978_v26  ;;  %v756_v36 = vld [vmem:[%s5038_s4 + $0x90] sm:$0xff]  ;;  %v759_v37 = vld [vmem:[%s5038_s4 + $0xa8] sm:$0xff]  ;;  %v4012_v38 = vpack.c.bf16 %v743_v33, %v740_v32  ;;  %v749_v41 = vld [vmem:[%s5038_s4 + $0x58] sm:$0xff] }
  0x2e   : > { %2929 = vmatprep.subr.bf16.mxu1 %v2928_v60  ;;  %5162 = vst [vmem:[#allocation10_spill] sm:$0xff] %v4000_v34  ;;  %v4022_v42 = vpack.c.bf16 %v759_v37, %v756_v36  ;;  %v4026_v43 = vpack.c.bf16 %v749_v41, %v746_v40  ;;  %v752_v44 = vld [vmem:[%s5038_s4 + $0x70] sm:$0xff]  ;;  %v755_v45 = vld [vmem:[%s5038_s4 + $0x88] sm:$0xff]  ;;  %v758_v47 = vld [vmem:[%s5038_s4 + $0xa0] sm:$0xff] }
  0x2f   : > { %2903 = vmatpush1.bf16.msra.mxu0 %v2902_v52  ;;  %5164 = vst [vmem:[#allocation12_spill] sm:$0xff] %v4012_v38  ;;  %v4037_v46 = vpack.c.bf16 %v755_v45, %v752_v44  ;;  %v761_v48 = vld [vmem:[%s5038_s4 + $0xb8] sm:$0xff]  ;;  %v763_v50 = vld [vmem:[%s5038_s4 + $0xc8] sm:$0xff]  ;;  %v766_v51 = vld [vmem:[%s5038_s4 + $0xe0] sm:$0xff] }
  0x30   : > { %2905 = vmatprep.subr.bf16.mxu0 %v2904_v55  ;;  %5165 = vst [vmem:[#allocation13_spill] sm:$0xff] %v4022_v42  ;;  %5166 = vst [vmem:[#allocation14_spill] sm:$0xff] %v4026_v43  ;;  %v4047_v49 = vpack.c.bf16 %v761_v48, %v758_v47  ;;  %v4058_v52 = vpack.c.bf16 %v766_v51, %v763_v50  ;;  %v762_v53 = vld [vmem:[%s5038_s4 + $0xc0] sm:$0xff]  ;;  %v765_v54 = vld [vmem:[%s5038_s4 + $0xd8] sm:$0xff] }
  0x31   : > { %2931 = vmatpush3.bf16.msra.mxu1 %v2928_v60  ;;  %5167 = vst [vmem:[#allocation15_spill] sm:$0xff] %v4037_v46  ;;  %v4066_v55 = vpack.c.bf16 %v765_v54, %v762_v53  ;;  %v764_v56 = vld [vmem:[%s5038_s4 + $0xd0] sm:$0xff]  ;;  %v767_v57 = vld [vmem:[%s5038_s4 + $0xe8] sm:$0xff]  ;;  %v769_v59 = vld [vmem:[%s5038_s4 + $0xf8] sm:$0xff] }
  0x32   : > { %2933 = vmatprep.subr.bf16.mxu1 %v2932_v5  ;;  %5168 = vst [vmem:[#allocation16_spill] sm:$0xff] %v4047_v49  ;;  %5169 = vst [vmem:[#allocation17_spill] sm:$0xff] %v4058_v52  ;;  %v4075_v58 = vpack.c.bf16 %v767_v57, %v764_v56  ;;  %v772_v60 = vld [vmem:[%s5038_s4 + $0x110] sm:$0xff]  ;;  %v771_v63 = vld [vmem:[%s5038_s4 + $0x108] sm:$0xff] }
  0x33   : > { %2907 = vmatpush1.bf16.msra.mxu0 %v2906_v61  ;;  %5170 = vst [vmem:[#allocation18_spill] sm:$0xff] %v4066_v55  ;;  %v4085_v61 = vpack.c.bf16 %v772_v60, %v769_v59  ;;  %v768_v62 = vld [vmem:[%s5038_s4 + $0xf0] sm:$0xff]  ;;  %v770_v1 = vld [vmem:[%s5038_s4 + $0x100] sm:$0xff]  ;;  %v773_v2 = vld [vmem:[%s5038_s4 + $0x118] sm:$0xff] }
  0x34   : > { %2909 = vmatprep.subr.bf16.mxu0 %v2908_v0  ;;  %5171 = vst [vmem:[#allocation19_spill] sm:$0xff] %v4075_v58  ;;  %v4093_v0 = vpack.c.bf16 %v771_v63, %v768_v62  ;;  %v4103_v3 = vpack.c.bf16 %v773_v2, %v770_v1  ;;  %v775_v4 = vld [vmem:[%s5038_s4 + $0x128] sm:$0xff]  ;;  %v774_v7 = vld [vmem:[%s5038_s4 + $0x120] sm:$0xff]  ;;  %v777_v9 = vld [vmem:[%s5038_s4 + $0x138] sm:$0xff] }
  0x35   : > { %2935 = vmatpush3.bf16.msra.mxu1 %v2932_v5  ;;  %5172 = vst [vmem:[#allocation20_spill] sm:$0xff] %v4085_v61  ;;  %v778_v5 = vld [vmem:[%s5038_s4 + $0x140] sm:$0xff]  ;;  %v4121_v11 = vpack.c.bf16 %v777_v9, %v774_v7  ;;  %v776_v12 = vld [vmem:[%s5038_s4 + $0x130] sm:$0xff]  ;;  %v779_v13 = vld [vmem:[%s5038_s4 + $0x148] sm:$0xff] }
  0x36   : > { %2937 = vmatprep.subr.bf16.mxu1 %v2936_v15  ;;  %5173 = vst [vmem:[#allocation21_spill] sm:$0xff] %v4093_v0  ;;  %5174 = vst [vmem:[#allocation22_spill] sm:$0xff] %v4103_v3  ;;  %v389_v14 = vld [vmem:[%s3778_s17 + $0x10] sm:$0xff]  ;;  %v781_v16 = vld [vmem:[%s5038_s4 + $0x158] sm:$0xff] }
  0x37   : > { %2911 = vmatpush1.bf16.msra.mxu0 %v2910_v6  ;;  %v4113_v6 = vpack.c.bf16 %v778_v5, %v775_v4  ;;  %5176 = vst [vmem:[#allocation24_spill] sm:$0xff] %v4121_v11  ;;  %v784_v17 = vld [vmem:[%s5038_s4 + $0x170] sm:$0xff]  ;;  %v783_v22 = vld [vmem:[%s5038_s4 + $0x168] sm:$0xff]  ;;  %v785_v27 = vld [vmem:[%s5038_s4 + $0x178] sm:$0xff] }
  0x38   : > { %2945 = vmatprep.subr.bf16.mxu0 %v3935_v10  ;;  %v4142_v20 = vpack.c.bf16 %v784_v17, %v781_v16  ;;  %v780_v21 = vld [vmem:[%s5038_s4 + $0x150] sm:$0xff]  ;;  %v390_v28 = vld [vmem:[%s3778_s17 + $0x18] sm:$0xff]  ;;  %v642_v33 = vld [vmem:[%s5037_s3] sm:$0xff] }
  0x39   : > { %2939 = vmatpush3.bf16.msra.mxu1 %v2936_v15  ;;  %5175 = vst [vmem:[#allocation23_spill] sm:$0xff] %v4113_v6  ;;  %v4132_v15 = vpack.c.bf16 %v779_v13, %v776_v12  ;;  %v4151_v23 = vpack.c.bf16 %v783_v22, %v780_v21  ;;  %v648_v36 = vld [vmem:[%s5037_s3 + $0x30] sm:$0xff]  ;;  %v645_v37 = vld [vmem:[%s5037_s3 + $0x18] sm:$0xff]  ;;  %v651_v41 = vld [vmem:[%s5037_s3 + $0x48] sm:$0xff] }
  0x3a   : > { %521 = vmatmul.mubr.f32.vlgmr.msra.gmra.mrb[0].mxu0 %v3848_v30  ;;  %v757_v30 = vld [vmem:[%s5038_s4 + $0x98] sm:$0xff]  ;;  %2941 = vmatprep.subr.bf16.mxu1 %v2940_v24  ;;  %5178 = vst [vmem:[#allocation26_spill] sm:$0xff] %v4142_v20  ;;  %v4184_v40 = vpack.c.bf16 %v648_v36, %v642_v33  ;;  %v644_v44 = vld [vmem:[%s5037_s3 + $0x10] sm:$0xff]  ;;  %v650_v45 = vld [vmem:[%s5037_s3 + $0x40] sm:$0xff]  ;;  %v4198_v48 = vpack.c.bf16 %v651_v41, %v645_v37 }
  0x3b   : > { %2947 = vmatpush1.bf16.msra.mxu0 %v3955_v18  ;;  %526 = vmatprep.mubr.f32.mxu0 %v5046_v8  ;;  %v4004_v35 = vpack.c.bf16 %v760_v31, %v757_v30  ;;  %5177 = vst [vmem:[#allocation25_spill] sm:$0xff] %v4132_v15  ;;  %5179 = vst [vmem:[#allocation27_spill] sm:$0xff] %v4151_v23  ;;  %v643_v30 = vld [vmem:[%s5037_s3 + $0x8] sm:$0xff]  ;;  %v649_v31 = vld [vmem:[%s5037_s3 + $0x38] sm:$0xff]  ;;  %v4200_v50 = vpack.c.bf16 %v650_v45, %v644_v44 }
  0x3c   : > { %2949 = vmatprep.subr.bf16.mxu0 %v3958_v19  ;;  %v4172_v32 = vpack.c.bf16 %v649_v31, %v643_v30  ;;  %v4196_v47 = vld [vmem:[#allocation4] sm:$0xff]  ;;  %5182 = vst [vmem:[#allocation30_spill] sm:$0xff] %v4198_v48  ;;  %v661_v53 = vld [vmem:[%s5037_s3 + $0x98] sm:$0xff]  ;;  %v654_v56 = vld [vmem:[%s5037_s3 + $0x60] sm:$0xff] }
  0x3d   : > { %5163 = vst [vmem:[#allocation11_spill] sm:$0xff] %v4004_v35  ;;  %2943 = vmatpush3.bf16.msra.mxu1 %v2940_v24  ;;  %v782_v24 = vld [vmem:[%s5038_s4 + $0x160] sm:$0xff]  ;;  %v655_v51 = vld [vmem:[%s5037_s3 + $0x68] sm:$0xff]  ;;  %v660_v57 = vld [vmem:[%s5037_s3 + $0x90] sm:$0xff] }
  0x3e   : > { %527 = vmatmul.mubr.f32.gmra.mrb[2].mxu0 %v388_v29  ;;  %2976 = vmatprep.subr.bf16.mxu1 %v5044_v39  ;;  %5181 = vst [vmem:[#allocation29_spill] sm:$0xff] %v4172_v32  ;;  %v4213_v54 = vpack.c.bf16 %v661_v53, %v655_v51  ;;  %v657_v59 = vld [vmem:[%s5037_s3 + $0x78] sm:$0xff]  ;;  %v4225_v60 = vpack.c.bf16 %v660_v57, %v654_v56  ;;  %v663_v62 = vld [vmem:[%s5037_s3 + $0xa8] sm:$0xff]  ;;  %v656_v63 = vld [vmem:[%s5037_s3 + $0x70] sm:$0xff] }
  0x3f   : > { %2951 = vmatpush1.bf16.msra.mxu0 %v3974_v25  ;;  %532 = vmatprep.mubr.f32.mxu0 %v5046_v8  ;;  %v662_v1 = vld [vmem:[%s5037_s3 + $0xa0] sm:$0xff]  ;;  %v4239_v2 = vpack.c.bf16 %v663_v62, %v657_v59  ;;  %v667_v5 = vld [vmem:[%s5037_s3 + $0xc8] sm:$0xff]  ;;  %v673_v7 = vld [vmem:[%s5037_s3 + $0xf8] sm:$0xff] }
  0x40   : > { %2953 = vmatprep.subr.bf16.mxu0 %v3978_v26  ;;  %2735 = vmatmul.mubr.f32.vlgmr.msra.gmra.mrb[0].mxu1 %v388_v29  ;;  %v4162_v29 = vpack.c.bf16 %v785_v27, %v782_v24  ;;  %v4241_v4 = vpack.c.bf16 %v662_v1, %v656_v63  ;;  %v666_v9 = vld [vmem:[%s5037_s3 + $0xc0] sm:$0xff]  ;;  %v4252_v12 = vpack.c.bf16 %v673_v7, %v667_v5  ;;  %v672_v13 = vld [vmem:[%s5037_s3 + $0xf0] sm:$0xff]  ;;  %v675_v16 = vld [vmem:[%s5037_s3 + $0x108] sm:$0xff] }
  0x41   : > { %2978 = vmatpush3.bf16.msra.mxu1 %v4012_v38  ;;  %2737 = vmatprep.mubr.f32.mxu1 %v389_v14  ;;  %v4266_v17 = vpack.c.bf16 %v672_v13, %v666_v9  ;;  %v668_v22 = vld [vmem:[%s5037_s3 + $0xd0] sm:$0xff]  ;;  %v674_v24 = vld [vmem:[%s5037_s3 + $0x100] sm:$0xff]  ;;  %v685_v30 = vld [vmem:[%s5037_s3 + $0x158] sm:$0xff] }
  0x42   : > { %2979 = vmatprep.subr.bf16.mxu1 %v5044_v39  ;;  %533 = vmatmul.mubr.f32.gmra.mrb[4].mxu0 %v389_v14  ;;  %5180 = vst [vmem:[#allocation28_spill] sm:$0xff] %v4162_v29  ;;  %v669_v14 = vld [vmem:[%s5037_s3 + $0xd8] sm:$0xff]  ;;  %v4278_v27 = vpack.c.bf16 %v674_v24, %v668_v22  ;;  %v678_v33 = vld [vmem:[%s5037_s3 + $0x120] sm:$0xff]  ;;  %v684_v36 = vld [vmem:[%s5037_s3 + $0x150] sm:$0xff] }
  0x43   : > { %2955 = vmatpush1.bf16.msra.mxu0 %v4000_v34  ;;  %538 = vmatprep.mubr.f32.mxu0 %v5046_v8  ;;  %v4268_v21 = vpack.c.bf16 %v675_v16, %v669_v14  ;;  %v681_v37 = vld [vmem:[%s5037_s3 + $0x138] sm:$0xff]  ;;  %v4299_v41 = vpack.c.bf16 %v684_v36, %v678_v33  ;;  %v687_v44 = vld [vmem:[%s5037_s3 + $0x168] sm:$0xff]  ;;  %v680_v45 = vld [vmem:[%s5037_s3 + $0x130] sm:$0xff] }
  0x44   : > { %2957 = vmatprep.subr.bf16.mxu0 %v4004_v35  ;;  %2738 = vmatmul.mubr.f32.gmra.mrb[2].mxu1 %v390_v28  ;;  %v686_v51 = vld [vmem:[%s5037_s3 + $0x160] sm:$0xff]  ;;  %v4312_v53 = vpack.c.bf16 %v687_v44, %v681_v37  ;;  %v691_v57 = vld [vmem:[%s5037_s3 + $0x188] sm:$0xff]  ;;  %v697_v59 = vld [vmem:[%s5037_s3 + $0x1b8] sm:$0xff] }
  0x45   : > { %2981 = vmatpush3.bf16.msra.mxu1 %v4026_v43  ;;  %2772 = vmatprep.mubr.msk.f32.mxu1 %vm3703_vm0, %v5046_v8  ;;  %v4314_v56 = vpack.c.bf16 %v686_v51, %v680_v45  ;;  %v4324_v62 = vpack.c.bf16 %v697_v59, %v691_v57  ;;  %v690_v63 = vld [vmem:[%s5037_s3 + $0x180] sm:$0xff]  ;;  %v696_v1 = vld [vmem:[%s5037_s3 + $0x1b0] sm:$0xff]  ;;  %v693_v5 = vld [vmem:[%s5037_s3 + $0x198] sm:$0xff] }
  0x46   : > { %2982 = vmatprep.subr.bf16.mxu1 %v5044_v39  ;;  %539 = vmatmul.mubr.f32.gmra.mrb[6].mxu0 %v390_v28  ;;  %v679_v28 = vld [vmem:[%s5037_s3 + $0x128] sm:$0xff]  ;;  %v4335_v7 = vpack.c.bf16 %v696_v1, %v690_v63  ;;  %v692_v13 = vld [vmem:[%s5037_s3 + $0x190] sm:$0xff]  ;;  %v698_v14 = vld [vmem:[%s5037_s3 + $0x1c0] sm:$0xff] }
  0x47   : > { %2959 = vmatpush1.bf16.msra.mxu0 %v4022_v42  ;;  %886 = vmatprep.mubr.f32.mxu0 %v5046_v8  ;;  %v4288_v31 = vpack.c.bf16 %v685_v30, %v679_v28  ;;  %5183 = vst [vmem:[#allocation31_spill] sm:$0xff] %v4324_v62  ;;  %v699_v9 = vld [vmem:[%s5037_s3 + $0x1c8] sm:$0xff]  ;;  %v4350_v22 = vpack.c.bf16 %v698_v14, %v692_v13  ;;  %v709_v28 = vld [vmem:[%s5037_s3 + $0x218] sm:$0xff]  ;;  %v702_v33 = vld [vmem:[%s5037_s3 + $0x1e0] sm:$0xff] }
  0x48   : > { %2961 = vmatprep.subr.bf16.mxu0 %v4058_v52  ;;  %5184 = vst [vmem:[#allocation32_spill] sm:$0xff] %v4335_v7  ;;  %v4348_v16 = vpack.c.bf16 %v699_v9, %v693_v5  ;;  %v703_v24 = vld [vmem:[%s5037_s3 + $0x1e8] sm:$0xff]  ;;  %v708_v36 = vld [vmem:[%s5037_s3 + $0x210] sm:$0xff]  ;;  %v705_v37 = vld [vmem:[%s5037_s3 + $0x1f8] sm:$0xff] }
  0x49   : > { %2984 = vmatpush3.bf16.msra.mxu1 %v4037_v46  ;;  %5186 = vst [vmem:[#allocation34_spill] sm:$0xff] %v4350_v22  ;;  %v4360_v30 = vpack.c.bf16 %v709_v28, %v703_v24  ;;  %v4371_v44 = vpack.c.bf16 %v708_v36, %v702_v33  ;;  %v711_v45 = vld [vmem:[%s5037_s3 + $0x228] sm:$0xff]  ;;  %v704_v51 = vld [vmem:[%s5037_s3 + $0x1f0] sm:$0xff]  ;;  %v710_v57 = vld [vmem:[%s5037_s3 + $0x220] sm:$0xff] }
  0x4a   : > { %2985 = vmatprep.subr.bf16.mxu1 %v5044_v39  ;;  %5185 = vst [vmem:[#allocation33_spill] sm:$0xff] %v4348_v16  ;;  %v4384_v59 = vpack.c.bf16 %v711_v45, %v705_v37  ;;  %v4386_v63 = vpack.c.bf16 %v710_v57, %v704_v51  ;;  %v715_v1 = vld [vmem:[%s5037_s3 + $0x248] sm:$0xff]  ;;  %v721_v5 = vld [vmem:[%s5037_s3 + $0x278] sm:$0xff]  ;;  %v714_v9 = vld [vmem:[%s5037_s3 + $0x240] sm:$0xff] }
  0x4b   : > { %2963 = vmatpush1.bf16.msra.mxu0 %v4066_v55  ;;  %5187 = vst [vmem:[#allocation35_spill] sm:$0xff] %v4360_v30  ;;  %5188 = vst [vmem:[#allocation36_spill] sm:$0xff] %v4371_v44  ;;  %v4397_v13 = vpack.c.bf16 %v721_v5, %v715_v1  ;;  %v720_v14 = vld [vmem:[%s5037_s3 + $0x270] sm:$0xff]  ;;  %v717_v24 = vld [vmem:[%s5037_s3 + $0x258] sm:$0xff] }
  0x4c   : > { %2965 = vmatprep.subr.bf16.mxu0 %v4085_v61  ;;  %5189 = vst [vmem:[#allocation37_spill] sm:$0xff] %v4384_v59  ;;  %5190 = vst [vmem:[#allocation38_spill] sm:$0xff] %v4386_v63  ;;  %v723_v28 = vld [vmem:[%s5037_s3 + $0x288] sm:$0xff]  ;;  %v4410_v33 = vpack.c.bf16 %v720_v14, %v714_v9  ;;  %v716_v37 = vld [vmem:[%s5037_s3 + $0x250] sm:$0xff] }
  0x4d   : > { %2987 = vmatpush3.bf16.msra.mxu1 %v4047_v49  ;;  %5191 = vst [vmem:[#allocation39_spill] sm:$0xff] %v4397_v13  ;;  %v4412_v36 = vpack.c.bf16 %v723_v28, %v717_v24  ;;  %v722_v45 = vld [vmem:[%s5037_s3 + $0x280] sm:$0xff]  ;;  %v727_v51 = vld [vmem:[%s5037_s3 + $0x2a8] sm:$0xff]  ;;  %v733_v57 = vld [vmem:[%s5037_s3 + $0x2d8] sm:$0xff] }
  0x4e   : > { %2988 = vmatprep.subr.bf16.mxu1 %v5044_v39  ;;  %5192 = vst [vmem:[#allocation40_spill] sm:$0xff] %v4410_v33  ;;  %v726_v1 = vld [vmem:[%s5037_s3 + $0x2a0] sm:$0xff]  ;;  %v732_v5 = vld [vmem:[%s5037_s3 + $0x2d0] sm:$0xff]  ;;  %v4434_v9 = vpack.c.bf16 %v722_v45, %v716_v37  ;;  %v4436_v14 = vpack.c.bf16 %v733_v57, %v727_v51  ;;  %v729_v24 = vld [vmem:[%s5037_s3 + $0x2b8] sm:$0xff] }
  0x4f   : > { %2967 = vmatpush1.bf16.msra.mxu0 %v4093_v0  ;;  %5193 = vst [vmem:[#allocation41_spill] sm:$0xff] %v4412_v36  ;;  %v735_v28 = vld [vmem:[%s5037_s3 + $0x2e8] sm:$0xff]  ;;  %v734_v37 = vld [vmem:[%s5037_s3 + $0x2e0] sm:$0xff]  ;;  %v653_v51 = vld [vmem:[%s5037_s3 + $0x58] sm:$0xff]  ;;  %v4460_v57 = vpack.c.bf16 %v732_v5, %v726_v1  ;;  %v441_v1 = vlaneseq }
  0x50   : > { %2969 = vmatprep.subr.bf16.mxu0 %v4113_v6  ;;  %5194 = vst [vmem:[#allocation42_spill] sm:$0xff] %v4434_v9  ;;  %5195 = vst [vmem:[#allocation43_spill] sm:$0xff] %v4436_v14  ;;  %v647_v45 = vld [vmem:[%s5037_s3 + $0x28] sm:$0xff] }
  0x51   : > { %2990 = vmatpush3.bf16.msra.mxu1 %v4075_v58  ;;  %5197 = vst [vmem:[#allocation45_spill] sm:$0xff] %v4460_v57  ;;  %v4473_v5 = vshrl.u32 %v441_v1, 7 }
  0x52   : > { %2991 = vmatprep.subr.bf16.mxu1 %v5044_v39 }
  0x53   : > { %2971 = vmatpush1.bf16.msra.mxu0 %v4121_v11 }
  0x54   : > { %2973 = vmatprep.subr.bf16.mxu0 %v4142_v20 }
  0x55   : > { %2993 = vmatpush3.bf16.msra.mxu1 %v4103_v3 }
  0x56   : > { %2994 = vmatprep.subr.bf16.mxu1 %v5044_v39 }
  0x57   : > { %2975 = vmatpush1.bf16.msra.mxu0 %v4151_v23 }
  0x58   : > { %3001 = vmatprep.subr.bf16.mxu0 %v4172_v32 }
  0x59   : > { %2996 = vmatpush3.bf16.msra.mxu1 %v4132_v15 }
  0x5a   : > { %2997 = vmatprep.subr.bf16.mxu1 %v5044_v39  ;;  %887 = vmatmul.mubr.f32.vlgmr.msra.gmra.mrb[8].mxu0 %v4196_v47  ;;  %v728_v39 = vld [vmem:[%s5037_s3 + $0x2b0] sm:$0xff] }
  0x5b   : > { %3003 = vmatpush1.bf16.msra.mxu0 %v4184_v40  ;;  %1055 = vmatprep.mubr.f32.mxu0 %v5046_v8 }
  0x5c   : > { %3005 = vmatprep.subr.bf16.mxu0 %v4213_v54 }
  0x5d   : > { %2999 = vmatpush3.bf16.msra.mxu1 %v4162_v29 }
  0x5e   : > { %3033 = vmatprep.subr.bf16.mxu1 %v4198_v48 }
  0x5f   : > { %3007 = vmatpush1.bf16.msra.mxu0 %v4225_v60 }
  0x60   : > { %2773 = vmatmul.mubr.f32.vlgmr.msra.gmra.mrb[4].mxu1 %v4196_v47  ;;  %3009 = vmatprep.subr.bf16.mxu0 %v4252_v12 }
  0x61   : > { %3035 = vmatpush1.bf16.msra.mxu1 %v4200_v50  ;;  %1126 = vmatprep.mubr.f32.mxu1 %v5046_v8  ;;  %v4448_v8 = vpack.c.bf16 %v735_v28, %v729_v24  ;;  %v4463_v24 = vpack.c.bf16 %v653_v51, %v647_v45  ;;  %v4466_v28 = vpack.c.bf16 %v734_v37, %v728_v39  ;;  %v5068_v45 = vsub.s32 0, %v4473_v5  ;;  %v439_v39 = vld [vmem:[%s5036_s2] sm:$0x7] }
  0x62   : > { %3037 = vmatprep.subr.bf16.mxu1 %v4239_v2  ;;  %v5073_v37 = vsub.s32 1, %v4473_v5 }
  0x63   : > { %3011 = vmatpush1.bf16.msra.mxu0 %v4266_v17  ;;  %5196 = vst [vmem:[#allocation44_spill] sm:$0xff] %v4448_v8  ;;  %5198 = vst [vmem:[#allocation46_spill] sm:$0xff] %v4463_v24  ;;  %v4482_v51 = vrot.slane %v439_v39, %v5068_v45 }
  0x64   : > { %3013 = vmatprep.subr.bf16.mxu0 %v4288_v31  ;;  %5199 = vst [vmem:[#allocation47_spill] sm:$0xff] %v4466_v28 }
  0x65   : > { %3039 = vmatpush1.bf16.msra.mxu1 %v4241_v4  ;;  %5200 = vst [vmem:[#allocation48_spill] sm:$0xff] %v4482_v51 }
  0x66   : > { %3041 = vmatprep.subr.bf16.mxu1 %v4268_v21 }
  0x67   : > { %3015 = vmatpush1.bf16.msra.mxu0 %v4299_v41 }
  0x68   : > { %3017 = vmatprep.subr.bf16.mxu0 %v4324_v62  ;;  %v671_v62 = vld [vmem:[%s5037_s3 + $0xe8] sm:$0xff] }
  0x69   : > { %3043 = vmatpush1.bf16.msra.mxu1 %v4278_v27 }
  0x6a   : > { %3045 = vmatprep.subr.bf16.mxu1 %v4312_v53 }
  0x6b   : > { %3019 = vmatpush1.bf16.msra.mxu0 %v4335_v7 }
  0x6c   : > { %3021 = vmatprep.subr.bf16.mxu0 %v4360_v30 }
  0x6d   : > { %3047 = vmatpush1.bf16.msra.mxu1 %v4314_v56 }
  0x6e   : > { %3049 = vmatprep.subr.bf16.mxu1 %v4348_v16  ;;  %v646_v16 = vld [vmem:[%s5037_s3 + $0x20] sm:$0xff] }
  0x6f   : > { %3023 = vmatpush1.bf16.msra.mxu0 %v4371_v44 }
  0x70   : > { %3025 = vmatprep.subr.bf16.mxu0 %v4397_v13 }
  0x71   : > { %3051 = vmatpush1.bf16.msra.mxu1 %v4350_v22  ;;  %v817_v22 = vld [vmem:[#allocation3] sm:$0xff] }
  0x72   : > { %3053 = vmatprep.subr.bf16.mxu1 %v4384_v59 }
  0x73   : > { %3027 = vmatpush1.bf16.msra.mxu0 %v4410_v33 }
  0x74   : > { %3029 = vmatprep.subr.bf16.mxu0 %v4436_v14 }
  0x75   : > { %3055 = vmatpush1.bf16.msra.mxu1 %v4386_v63 }
  0x76   : > { %3057 = vmatprep.subr.bf16.mxu1 %v4412_v36 }
  0x77   : > { %3031 = vmatpush1.bf16.msra.mxu0 %v4460_v57 }
  0x78   : > { %3065 = vmatprep.subr.bf16.mxu0 %v4463_v24  ;;  %v4486_v24 = vrot.slane %v439_v39, %v5073_v37 }
  0x79   : > { %3059 = vmatpush1.bf16.msra.mxu1 %v4434_v9  ;;  %v820_v9 = vld [vmem:[#allocation5 + $0x8] sm:$0xff] }
  0x7a   : > { %3061 = vmatprep.subr.bf16.mxu1 %v4448_v8 }
  0x7d   : > { %3063 = vmatpush1.bf16.msra.mxu1 %v4466_v28  ;;  %v819_v28 = vld [vmem:[#allocation5] sm:$0xff] }
  0x7e   : > { %3097 = vmatprep.subr.bf16.mxu1 %v3935_v10 }
 0x10d   : > { %v522_v10 = vpop.f32.mrb[0].mxu0 }
 0x10e   : > { %v523_v1 = vadd.f32 %v522_v10, %v4482_v51  ;;  %v524_v57 = vpop.f32.mrb[1].mxu0  ;;  %v5084_v10 = vsub.s32 2, %v4473_v5 }
 0x10f   : > { %v525_v8 = vadd.f32 %v524_v57, %v4486_v24 }
 0x110   : > { %v969_v14 = vadd.f32 %v819_v28, %v523_v1  ;;  %v4500_v28 = vld [vmem:[%s5040_s6] ss:$0 sm:$0xff] }
 0x111   : > { %v4490_v33 = vpop.f32.mrb[2].mxu0  ;;  %v976_v45 = vadd.f32 %v820_v9, %v525_v8  ;;  %v4504_v8 = vrot.slane %v439_v39, %v5084_v10  ;;  %v652_v39 = vld [vmem:[%s5037_s3 + $0x50] sm:$0xff] }
 0x112   : > { %v2590_v36 = vmul.f32 -1.442695, %v969_v14  ;;  %v4492_v13 = vpop.f32.mrb[3].mxu0  ;;  %v821_v14 = vld [vmem:[#allocation5 + $0x10] sm:$0xff]  ;;  %v664_v10 = vld [vmem:[%s5037_s3 + $0xb0] sm:$0xff] }
 0x113   : > { %v2591_v63 = vmul.f32 -1.442695, %v976_v45  ;;  %v4494_v44 = vpop.f32.mrb[0].mxu1  ;;  %v983_v9 = vadd.f32 %v4500_v28, %v821_v14  ;;  %v665_v14 = vld [vmem:[%s5037_s3 + $0xb8] sm:$0xff] }
 0x114   : > { %3596 = vpow2.f32 %v2590_v36  ;;  %v611_v37 = vpop.f32.mrb[1].mxu1 }
 0x115   : > { %3598 = vpow2.f32 %v2591_v63  ;;  %v612_v63 = vadd.f32 %v611_v37, %v4504_v8  ;;  %v659_v37 = vld [vmem:[%s5037_s3 + $0x88] sm:$0xff] }
 0x11e   : > { %v3597_v59 = vpop.eup %3596 }
 0x11f   : > { %v973_v30 = vadd.f32 1.0, %v3597_v59  ;;  %v3599_v57 = vpop.eup %3598 }
 0x120   : > { %v980_v36 = vadd.f32 1.0, %v3599_v57 }
 0x121   : > { %3600 = vrcp.f32 %v973_v30 }
 0x122   : > { %3602 = vrcp.f32 %v980_v36 }
 0x12b   : > { %v3601_v59 = vpop.eup %3600 }
 0x12c   : > { %v984_v30 = vmul.f32 %v3601_v59, %v983_v9  ;;  %v3603_v1 = vpop.eup %3602 }
 0x12d   : > { %v987_v7 = vsub.f32 1.0, %v3603_v1  ;;  %v989_v9 = vmul.f32 %v3603_v1, %v817_v22  ;;  %v5202_v22 = vmov 0.0  }
 0x12e   : > { %v985_v45 = vadd.f32 %v984_v30, %v612_v63  ;;  %v4520_v63 = vpack.c.bf16 %v652_v39, %v646_v16  ;;  %v4524_v30 = vpack.c.bf16 %v665_v14, %v659_v37  ;;  %v670_v39 = vld [vmem:[%s5037_s3 + $0xe0] sm:$0xff]  ;;  %v689_v37 = vld [vmem:[%s5037_s3 + $0x178] sm:$0xff] }
 0x130   : > { %3604 = vtanh.f32 %v985_v45  ;;  %5201 = vst [vmem:[#allocation49_spill] sm:$0xff] %v4520_v63  ;;  %v658_v45 = vld [vmem:[%s5037_s3 + $0x80] sm:$0xff] }
 0x131   : > { %v4541_v16 = vpack.c.bf16 %v664_v10, %v658_v45  ;;  %v683_v10 = vld [vmem:[%s5037_s3 + $0x148] sm:$0xff] }
 0x132   : > { %v4566_v14 = vpack.c.bf16 %v689_v37, %v683_v10  ;;  %v695_v45 = vld [vmem:[%s5037_s3 + $0x1a8] sm:$0xff]  ;;  %v694_v10 = vld [vmem:[%s5037_s3 + $0x1a0] sm:$0xff]  ;;  %v700_v37 = vld [vmem:[%s5037_s3 + $0x1d0] sm:$0xff] }
 0x134   : > { %5205 = vst [vmem:[#allocation52_spill] sm:$0xff] %v4566_v14 }
 0x13a   : > { %v3605_v57 = vpop.eup %3604 }
 0x13b   : > { %v988_v36 = vmul.f32 %v3605_v57, %v987_v7  ;;  %v677_v7 = vld [vmem:[%s5037_s3 + $0x118] sm:$0xff]  ;;  %v676_v57 = vld [vmem:[%s5037_s3 + $0x110] sm:$0xff] }
 0x13c   : > { %v4545_v1 = vpack.c.bf16 %v677_v7, %v671_v62  ;;  %v4563_v62 = vpack.c.bf16 %v676_v57, %v670_v39  ;;  %v701_v7 = vld [vmem:[%s5037_s3 + $0x1d8] sm:$0xff] }
 0x13d   : > { %v4522_v59 = vadd.f32 %v989_v9, %v988_v36  ;;  %v682_v36 = vld [vmem:[%s5037_s3 + $0x140] sm:$0xff]  ;;  %v688_v9 = vld [vmem:[%s5037_s3 + $0x170] sm:$0xff]  ;;  %v4586_v57 = vpack.c.bf16 %v701_v7, %v695_v45 }
 0x13e   : > { %5203 = vst [vmem:[#allocation50_spill] sm:$0xff] %v4545_v1  ;;  %5204 = vst [vmem:[#allocation51_spill] sm:$0xff] %v4563_v62  ;;  %v4583_v39 = vpack.c.bf16 %v688_v9, %v682_v36  ;;  %v713_v36 = vld [vmem:[%s5037_s3 + $0x238] sm:$0xff]  ;;  %v4603_v9 = vpack.c.bf16 %v700_v37, %v694_v10  ;;  %v706_v7 = vld [vmem:[%s5037_s3 + $0x200] sm:$0xff] }
 0x13f   : > { %1056 = vmatmul.mubr.f32.vlgmr.msra.gmra.mrb[8].mxu0 %v4522_v59  ;;  %1127 = vmatmul.mubr.f32.vlgmr.msra.gmra.mrb[6].mxu1 %v4522_v59  ;;  %5207 = vst [vmem:[#allocation54_spill] sm:$0xff] %v4586_v57  ;;  %v725_v10 = vld [vmem:[%s5037_s3 + $0x298] sm:$0xff] }
 0x140   : > { %3067 = vmatpush1.bf16.msra.mxu0 %v4520_v63  ;;  %1197 = vmatprep.mubr.f32.mxu0 %v5202_v22  ;;  %5206 = vst [vmem:[#allocation53_spill] sm:$0xff] %v4583_v39  ;;  %5208 = vst [vmem:[#allocation55_spill] sm:$0xff] %v4603_v9 }
 0x141   : > { %3069 = vmatprep.subr.bf16.mxu0 %v4524_v30  ;;  %3099 = vmatpush1.bf16.msra.mxu1 %v3955_v18 }
 0x142   : > { %3101 = vmatprep.subr.bf16.mxu1 %v3958_v19  ;;  %1294 = vmatprep.mubr.f32.mxu1 %v5202_v22 }
 0x144   : > { %3071 = vmatpush1.bf16.msra.mxu0 %v4541_v16 }
 0x145   : > { %3073 = vmatprep.subr.bf16.mxu0 %v4545_v1  ;;  %3103 = vmatpush1.bf16.msra.mxu1 %v3974_v25 }
 0x146   : > { %3105 = vmatprep.subr.bf16.mxu1 %v3978_v26 }
 0x148   : > { %3075 = vmatpush1.bf16.msra.mxu0 %v4563_v62  ;;  %v707_v62 = vld [vmem:[%s5037_s3 + $0x208] sm:$0xff] }
 0x149   : > { %3077 = vmatprep.subr.bf16.mxu0 %v4566_v14  ;;  %3107 = vmatpush1.bf16.msra.mxu1 %v4000_v34  ;;  %v4606_v45 = vpack.c.bf16 %v713_v36, %v707_v62  ;;  %v712_v34 = vld [vmem:[%s5037_s3 + $0x230] sm:$0xff]  ;;  %v718_v36 = vld [vmem:[%s5037_s3 + $0x260] sm:$0xff] }
 0x14a   : > { %3109 = vmatprep.subr.bf16.mxu1 %v4004_v35  ;;  %v4623_v62 = vpack.c.bf16 %v712_v34, %v706_v7  ;;  %v737_v34 = vld [vmem:[%s5037_s3 + $0x2f8] sm:$0xff] }
 0x14b   : > { %5209 = vst [vmem:[#allocation56_spill] sm:$0xff] %v4606_v45 }
 0x14c   : > { %3079 = vmatpush1.bf16.msra.mxu0 %v4583_v39  ;;  %v719_v39 = vld [vmem:[%s5037_s3 + $0x268] sm:$0xff]  ;;  %5210 = vst [vmem:[#allocation57_spill] sm:$0xff] %v4623_v62 }
 0x14d   : > { %3081 = vmatprep.subr.bf16.mxu0 %v4586_v57  ;;  %3111 = vmatpush1.bf16.msra.mxu1 %v4022_v42  ;;  %v4626_v37 = vpack.c.bf16 %v725_v10, %v719_v39  ;;  %v724_v42 = vld [vmem:[%s5037_s3 + $0x290] sm:$0xff]  ;;  %v730_v10 = vld [vmem:[%s5037_s3 + $0x2c0] sm:$0xff] }
 0x14e   : > { %3113 = vmatprep.subr.bf16.mxu1 %v4058_v52  ;;  %v4643_v39 = vpack.c.bf16 %v724_v42, %v718_v36 }
 0x14f   : > { %5211 = vst [vmem:[#allocation58_spill] sm:$0xff] %v4626_v37 }
 0x150   : > { %3083 = vmatpush1.bf16.msra.mxu0 %v4603_v9  ;;  %v731_v9 = vld [vmem:[%s5037_s3 + $0x2c8] sm:$0xff]  ;;  %5212 = vst [vmem:[#allocation59_spill] sm:$0xff] %v4643_v39 }
 0x151   : > { %3085 = vmatprep.subr.bf16.mxu0 %v4606_v45  ;;  %3115 = vmatpush1.bf16.msra.mxu1 %v4066_v55  ;;  %v4646_v7 = vpack.c.bf16 %v737_v34, %v731_v9  ;;  %v736_v55 = vld [vmem:[%s5037_s3 + $0x2f0] sm:$0xff]  ;;  %v5215_v9 = vmov 0.0|0.0  }
 0x152   : > { %3117 = vmatprep.subr.bf16.mxu1 %v4085_v61  ;;  %v4657_v42 = vpack.c.bf16 %v736_v55, %v730_v10  ;;  %v4675_v55 = vpop.f32.mrb[4].mxu0  ;;  %v4683_v10 = vpop.f32.mrb[2].mxu1 }
 0x153   : > { %5213 = vst [vmem:[#allocation60_spill] sm:$0xff] %v4646_v7  ;;  %5216 = vst [vmem:[#allocation62_spill] sm:$0xff] %v4675_v55  ;;  %v4677_v36 = vpop.f32.mrb[5].mxu0 }
 0x154   : > { %3087 = vmatpush1.bf16.msra.mxu0 %v4623_v62  ;;  %5214 = vst [vmem:[#allocation61_spill] sm:$0xff] %v4657_v42  ;;  %5217 = vst [vmem:[#allocation63_spill] sm:$0xff] %v4677_v36  ;;  %v4681_v34 = vpop.f32.mrb[6].mxu0 }
 0x155   : > { %3089 = vmatprep.subr.bf16.mxu0 %v4626_v37  ;;  %3119 = vmatpush1.bf16.msra.mxu1 %v4093_v0  ;;  %5218 = vst [vmem:[#allocation64_spill] sm:$0xff] %v4681_v34  ;;  %5219 = vst [vmem:[#allocation65_spill] sm:$0xff] %v4683_v10  ;;  %v786_v10 = vld [vmem:[%s5039_s5] sm:$0x7] }
 0x156   : > { %3121 = vmatprep.subr.bf16.mxu1 %v4113_v6 }
 0x158   : > { %3091 = vmatpush1.bf16.msra.mxu0 %v4643_v39 }
 0x159   : > { %3093 = vmatprep.subr.bf16.mxu0 %v4646_v7  ;;  %3123 = vmatpush1.bf16.msra.mxu1 %v4121_v11 }
 0x15a   : > { %3125 = vmatprep.subr.bf16.mxu1 %v4142_v20 }
 0x15c   : > { %3095 = vmatpush1.bf16.msra.mxu0 %v4657_v42 }
 0x15d   : > { %3128 = vmatprep.subr.bf16.mxu0 %v5215_v9  ;;  %3127 = vmatpush1.bf16.msra.mxu1 %v4151_v23 }
 0x15e   : > { %3153 = vmatprep.subr.bf16.mxu1 %v4172_v32 }
 0x15f   : > { %1198 = vmatmul.mubr.f32.vlgmr.msra.gmra.mrb[10].mxu0 %v4522_v59 }
 0x160   : > { %3130 = vmatpush3.bf16.msra.mxu0 %v4012_v38  ;;  %2807 = vmatprep.mubr.msk.f32.mxu0 %vm3703_vm0, %v5202_v22  ;;  %v4685_v38 = vpop.f32.mrb[7].mxu0 }
 0x161   : > { %3131 = vmatprep.subr.bf16.mxu0 %v5215_v9  ;;  %5220 = vst [vmem:[#allocation66_spill] sm:$0xff] %v4685_v38  ;;  %v5222_v38 = vsub.s32 0, %v4473_v5 }
 0x163   : > { %v4702_v34 = vrot.slane %v786_v10, %v5222_v38 }
 0x164   : > { %3133 = vmatpush3.bf16.msra.mxu0 %v4026_v43  ;;  %v4687_v43 = vpop.f32.mrb[3].mxu1 }
 0x165   : > { %3134 = vmatprep.subr.bf16.mxu0 %v5215_v9  ;;  %5221 = vst [vmem:[#allocation67_spill] sm:$0xff] %v4687_v43  ;;  %5223 = vst [vmem:[#allocation68_spill] sm:$0xff] %v4702_v34 }
 0x168   : > { %3136 = vmatpush3.bf16.msra.mxu0 %v4037_v46  ;;  %v959_v46 = vpop.f32.mrb[4].mxu1 }
 0x169   : > { %3137 = vmatprep.subr.bf16.mxu0 %v5215_v9  ;;  %v2774_v36 = vpop.f32.mrb[5].mxu1 }
 0x16a   : > { %v529_v36 = vadd.f32 %v4490_v33, %v4482_v51 }
 0x16c   : > { %3139 = vmatpush3.bf16.msra.mxu0 %v4047_v49 }
 0x16d   : > { %3140 = vmatprep.subr.bf16.mxu0 %v5215_v9 }
 0x170   : > { %3142 = vmatpush3.bf16.msra.mxu0 %v4075_v58 }
 0x171   : > { %3143 = vmatprep.subr.bf16.mxu0 %v5215_v9 }
 0x174   : > { %3145 = vmatpush3.bf16.msra.mxu0 %v4103_v3 }
 0x175   : > { %3146 = vmatprep.subr.bf16.mxu0 %v5215_v9 }
 0x178   : > { %3148 = vmatpush3.bf16.msra.mxu0 %v4132_v15  ;;  %v5224_v15 = vsub.s32 1, %v4473_v5 }
 0x179   : > { %3149 = vmatprep.subr.bf16.mxu0 %v5215_v9 }
 0x17a   : > { %v4708_v3 = vrot.slane %v786_v10, %v5224_v15 }
 0x17c   : > { %3151 = vmatpush3.bf16.msra.mxu0 %v4162_v29 }
 0x17d   : > { %3185 = vmatprep.subr.bf16.mxu0 %v4198_v48 }
 0x212   : > { %v1057_v43 = vpop.f32.mrb[8].mxu0  ;;  %v1128_v55 = vpop.f32.mrb[6].mxu1 }
 0x213   : > { %v1204_v29 = vadd.f32 %v1057_v43, %v4702_v34  ;;  %v1059_v48 = vpop.f32.mrb[9].mxu0  ;;  %v1130_v58 = vpop.f32.mrb[7].mxu1  ;;  %v4715_v43 = vld [vmem:[%s5041_s7] ss:$0 sm:$0xff] }
 0x214   : > { %v1377_v49 = vadd.f32 %v1130_v58, %v529_v36  ;;  %v1205_v23 = vadd.f32 %v1059_v48, %v4708_v3  ;;  %v5225_v58 = vsub.s32 2, %v4473_v5 }
 0x215   : > { %v2592_v32 = vmul.f32 -1.442695, %v1204_v29 }
 0x216   : > { %v2594_v9 = vmul.f32 -1.442695, %v1377_v49  ;;  %v2593_v38 = vmul.f32 -1.442695, %v1205_v23  ;;  %v4719_v29 = vrot.slane %v786_v10, %v5225_v58  ;;  %v1221_v23 = vadd.f32 %v4715_v43, %v959_v46 }
 0x217   : > { %3606 = vpow2.f32 %v2592_v32  ;;  %v617_v46 = vadd.f32 %v4494_v44, %v4504_v8 }
 0x218   : > { %3608 = vpow2.f32 %v2594_v9  ;;  %v1206_v48 = vadd.f32 %v1128_v55, %v4719_v29 }
 0x219   : > { %3610 = vpow2.f32 %v2593_v38 }
 0x221   : > { %v3607_v33 = vpop.eup %3606 }
 0x222   : > { %v1211_v51 = vadd.f32 1.0, %v3607_v33  ;;  %v3609_v42 = vpop.eup %3608 }
 0x223   : > { %v1381_v20 = vadd.f32 1.0, %v3609_v42  ;;  %v3611_v15 = vpop.eup %3610 }
 0x224   : > { %3612 = vrcp.f32 %v1211_v51  ;;  %v1218_v49 = vadd.f32 1.0, %v3611_v15  ;;  %v531_v51 = vadd.f32 %v4492_v13, %v4486_v24 }
 0x225   : > { %3614 = vrcp.f32 %v1381_v20 }
 0x226   : > { %3616 = vrcp.f32 %v1218_v49 }
 0x22e   : > { %v3613_v32 = vpop.eup %3612 }
 0x22f   : > { %v1222_v9 = vmul.f32 %v3613_v32, %v1221_v23  ;;  %v3615_v10 = vpop.eup %3614 }
 0x230   : > { %v3617_v58 = vpop.eup %3616 }
 0x231   : > { %v1223_v42 = vadd.f32 %v1222_v9, %v1206_v48  ;;  %v1225_v49 = vsub.f32 1.0, %v3617_v58  ;;  %v1227_v32 = vmul.f32 %v3617_v58, %v4196_v47  ;;  %v5232_v58 = vld [vmem:[#allocation36_spill] sm:$0xff] }
 0x232   : > { %v1199_v36 = vpop.f32.mrb[10].mxu0 }
 0x233   : > { %3618 = vtanh.f32 %v1223_v42  ;;  %v1384_v38 = vadd.f32 %v1199_v36, %v531_v51  ;;  %v1201_v33 = vpop.f32.mrb[11].mxu0  ;;  %v5226_v36 = vld [vmem:[#allocation31_spill] sm:$0xff] }
 0x234   : > { %v1391_v5 = vadd.f32 %v4500_v28, %v1201_v33 }
 0x235   : > { %v2595_v20 = vmul.f32 -1.442695, %v1384_v38  ;;  %v5227_v38 = vld [vmem:[#allocation33_spill] sm:$0xff] }
 0x236   : > { %v1392_v15 = vmul.f32 %v3615_v10, %v1391_v5  ;;  %v5228_v10 = vld [vmem:[#allocation32_spill] sm:$0xff] }
 0x237   : > { %3620 = vpow2.f32 %v2595_v20  ;;  %v5229_v20 = vld [vmem:[#allocation34_spill] sm:$0xff] }
 0x238   : > { %v1393_v55 = vadd.f32 %v1392_v15, %v617_v46  ;;  %v5230_v15 = vld [vmem:[#allocation35_spill] sm:$0xff] }
 0x23d   : > { %v3619_v23 = vpop.eup %3618 }
 0x23e   : > { %v1226_v13 = vmul.f32 %v3619_v23, %v1225_v49  ;;  %v5233_v49 = vld [vmem:[#allocation38_spill] sm:$0xff]  ;;  %v5234_v23 = vld [vmem:[#allocation39_spill] sm:$0xff] }
 0x240   : > { %v4729_v48 = vadd.f32 %v1227_v32, %v1226_v13  ;;  %v5235_v13 = vld [vmem:[#allocation41_spill] sm:$0xff]  ;;  %v5236_v32 = vld [vmem:[#allocation40_spill] sm:$0xff] }
 0x241   : > { %v3621_v9 = vpop.eup %3620 }
 0x242   : > { %v1388_v51 = vadd.f32 1.0, %v3621_v9  ;;  %1229 = vst [vmem:[%s3783_s20] sm:$0xff] %v4729_v48  ;;  %1295 = vmatmul.mubr.f32.vlgmr.msra.gmra.mrb[8].mxu1 %v4729_v48  ;;  %2808 = vmatmul.mubr.f32.vlgmr.msra.gmra.mrb[12].mxu0 %v4729_v48  ;;  %v5238_v9 = vld [vmem:[#allocation43_spill] sm:$0xff] }
 0x243   : > { %3155 = vmatpush1.bf16.msra.mxu1 %v4184_v40  ;;  %3187 = vmatpush1.bf16.msra.mxu0 %v4200_v50 }
 0x244   : > { %3622 = vrcp.f32 %v1388_v51  ;;  %3157 = vmatprep.subr.bf16.mxu1 %v4213_v54  ;;  %3189 = vmatprep.subr.bf16.mxu0 %v4239_v2  ;;  %v5239_v51 = vld [vmem:[#allocation44_spill] sm:$0xff] }
 0x245   : > { %1463 = vmatprep.mubr.f32.mxu1 %v5202_v22  ;;  %1534 = vmatprep.mubr.f32.mxu0 %v5202_v22  ;;  %3624 = vtanh.f32 %v1393_v55  ;;  %v5231_v55 = vld [vmem:[#allocation37_spill] sm:$0xff] }
 0x247   : > { %3159 = vmatpush1.bf16.msra.mxu1 %v4225_v60  ;;  %3191 = vmatpush1.bf16.msra.mxu0 %v4241_v4 }
 0x248   : > { %3161 = vmatprep.subr.bf16.mxu1 %v4252_v12  ;;  %3193 = vmatprep.subr.bf16.mxu0 %v4268_v21 }
 0x24b   : > { %3163 = vmatpush1.bf16.msra.mxu1 %v4266_v17  ;;  %3195 = vmatpush1.bf16.msra.mxu0 %v4278_v27 }
 0x24c   : > { %3165 = vmatprep.subr.bf16.mxu1 %v4288_v31  ;;  %3197 = vmatprep.subr.bf16.mxu0 %v4312_v53 }
 0x24e   : > { %v3623_v47 = vpop.eup %3622 }
 0x24f   : > { %3167 = vmatpush1.bf16.msra.mxu1 %v4299_v41  ;;  %3199 = vmatpush1.bf16.msra.mxu0 %v4314_v56  ;;  %v1395_v44 = vsub.f32 1.0, %v3623_v47  ;;  %v3625_v42 = vpop.eup %3624  ;;  %v1397_v5 = vmul.f32 %v3623_v47, %v4522_v59  ;;  %v5237_v59 = vld [vmem:[#allocation42_spill] sm:$0xff]  ;;  %v5240_v47 = vld [vmem:[#allocation45_spill] sm:$0xff] }
 0x250   : > { %3169 = vmatprep.subr.bf16.mxu1 %v5226_v36  ;;  %3201 = vmatprep.subr.bf16.mxu0 %v5227_v38 }
 0x251   : > { %v1396_v33 = vmul.f32 %v3625_v42, %v1395_v44  ;;  %v5241_v44 = vld [vmem:[#allocation47_spill] sm:$0xff]  ;;  %v5242_v42 = vld [vmem:[#allocation46_spill] sm:$0xff] }
 0x253   : > { %3171 = vmatpush1.bf16.msra.mxu1 %v5228_v10  ;;  %3203 = vmatpush1.bf16.msra.mxu0 %v5229_v20  ;;  %v4756_v46 = vadd.f32 %v1397_v5, %v1396_v33  ;;  %v5243_v33 = vld [vmem:[#allocation6_spill] sm:$0xff]  ;;  %v5244_v5 = vld [vmem:[#allocation51_spill] sm:$0xff] }
 0x254   : > { %3173 = vmatprep.subr.bf16.mxu1 %v5230_v15  ;;  %3205 = vmatprep.subr.bf16.mxu0 %v5231_v55 }
 0x257   : > { %3175 = vmatpush1.bf16.msra.mxu1 %v5232_v58  ;;  %3207 = vmatpush1.bf16.msra.mxu0 %v5233_v49 }
 0x258   : > { %3177 = vmatprep.subr.bf16.mxu1 %v5234_v23  ;;  %3209 = vmatprep.subr.bf16.mxu0 %v5235_v13 }
 0x25b   : > { %3179 = vmatpush1.bf16.msra.mxu1 %v5236_v32  ;;  %3211 = vmatpush1.bf16.msra.mxu0 %v5237_v59 }
 0x25c   : > { %3181 = vmatprep.subr.bf16.mxu1 %v5238_v9  ;;  %3213 = vmatprep.subr.bf16.mxu0 %v5239_v51 }
 0x25f   : > { %3183 = vmatpush1.bf16.msra.mxu1 %v5240_v47  ;;  %3215 = vmatpush1.bf16.msra.mxu0 %v5241_v44 }
 0x260   : > { %3217 = vmatprep.subr.bf16.mxu1 %v5242_v42  ;;  %3249 = vmatprep.subr.bf16.mxu0 %v5243_v33 }
 0x262   : > { %1464 = vmatmul.mubr.f32.vlgmr.msra.gmra.mrb[8].mxu1 %v4756_v46  ;;  %1535 = vmatmul.mubr.f32.vlgmr.msra.gmra.mrb[14].mxu0 %v4756_v46 }
 0x263   : > { %3219 = vmatpush1.bf16.msra.mxu1 %v4520_v63  ;;  %1605 = vmatprep.mubr.f32.mxu1 %v5202_v22  ;;  %v5245_v63 = vld [vmem:[#allocation10_spill] sm:$0xff] }
 0x264   : > { %3221 = vmatprep.subr.bf16.mxu1 %v4524_v30  ;;  %3251 = vmatpush1.bf16.msra.mxu0 %v3955_v18  ;;  %v5246_v18 = vld [vmem:[#allocation53_spill] sm:$0xff] }
 0x265   : > { %3253 = vmatprep.subr.bf16.mxu0 %v3958_v19  ;;  %1703 = vmatprep.mubr.f32.mxu0 %v5202_v22  ;;  %v5247_v19 = vld [vmem:[#allocation13_spill] sm:$0xff] }
 0x267   : > { %3223 = vmatpush1.bf16.msra.mxu1 %v4541_v16 }
 0x268   : > { %3225 = vmatprep.subr.bf16.mxu1 %v4545_v1  ;;  %3255 = vmatpush1.bf16.msra.mxu0 %v3974_v25  ;;  %v5248_v1 = vld [vmem:[#allocation55_spill] sm:$0xff] }
 0x269   : > { %3257 = vmatprep.subr.bf16.mxu0 %v3978_v26  ;;  %v5249_v26 = vld [vmem:[#allocation18_spill] sm:$0xff] }
 0x26b   : > { %3227 = vmatpush1.bf16.msra.mxu1 %v5244_v5 }
 0x26c   : > { %3229 = vmatprep.subr.bf16.mxu1 %v4566_v14  ;;  %3259 = vmatpush1.bf16.msra.mxu0 %v5245_v63 }
 0x26d   : > { %3261 = vmatprep.subr.bf16.mxu0 %v4004_v35 }
 0x26f   : > { %3231 = vmatpush1.bf16.msra.mxu1 %v5246_v18 }
 0x270   : > { %3233 = vmatprep.subr.bf16.mxu1 %v4586_v57  ;;  %3263 = vmatpush1.bf16.msra.mxu0 %v5247_v19 }
 0x271   : > { %3265 = vmatprep.subr.bf16.mxu0 %v4058_v52 }
 0x273   : > { %3235 = vmatpush1.bf16.msra.mxu1 %v5248_v1  ;;  %v5250_v1 = vld [vmem:[#allocation26_spill] sm:$0xff] }
 0x274   : > { %3237 = vmatprep.subr.bf16.mxu1 %v4606_v45  ;;  %3267 = vmatpush1.bf16.msra.mxu0 %v5249_v26  ;;  %v5251_v45 = vld [vmem:[#allocation61_spill] sm:$0xff]  ;;  %v5252_v26 = vmov 0.0|0.0  }
 0x275   : > { %3269 = vmatprep.subr.bf16.mxu0 %v4085_v61  ;;  %v5253_v61 = vld [vmem:[#allocation27_spill] sm:$0xff] }
 0x277   : > { %3239 = vmatpush1.bf16.msra.mxu1 %v4623_v62  ;;  %v5254_v62 = vld [vmem:[#allocation29_spill] sm:$0xff] }
 0x278   : > { %3241 = vmatprep.subr.bf16.mxu1 %v4626_v37  ;;  %3271 = vmatpush1.bf16.msra.mxu0 %v4093_v0  ;;  %v5255_v0 = vld [vmem:[#allocation12_spill] sm:$0xff] }
 0x279   : > { %3273 = vmatprep.subr.bf16.mxu0 %v4113_v6  ;;  %v5265_v6 = vld [vmem:[#allocation62_spill] sm:$0xff] }
 0x27b   : > { %3243 = vmatpush1.bf16.msra.mxu1 %v4643_v39  ;;  %v5264_v39 = vld [vmem:[#allocation48_spill] sm:$0xff] }
 0x27c   : > { %3245 = vmatprep.subr.bf16.mxu1 %v4646_v7  ;;  %3275 = vmatpush1.bf16.msra.mxu0 %v4121_v11  ;;  %v5256_v11 = vld [vmem:[#allocation14_spill] sm:$0xff]  ;;  %v535_v37 = vadd.f32 %v5265_v6, %v5264_v39 }
 0x27d   : > { %3277 = vmatprep.subr.bf16.mxu0 %v5250_v1  ;;  %v5261_v1 = vld [vmem:[#allocation25_spill] sm:$0xff] }
 0x27f   : > { %3247 = vmatpush1.bf16.msra.mxu1 %v5251_v45  ;;  %v5257_v45 = vld [vmem:[#allocation15_spill] sm:$0xff] }
 0x280   : > { %3280 = vmatprep.subr.bf16.mxu1 %v5252_v26  ;;  %3279 = vmatpush1.bf16.msra.mxu0 %v5253_v61  ;;  %v5258_v61 = vld [vmem:[#allocation16_spill] sm:$0xff] }
 0x281   : > { %3305 = vmatprep.subr.bf16.mxu0 %v5254_v62  ;;  %v5259_v62 = vld [vmem:[#allocation19_spill] sm:$0xff] }
 0x282   : > { %1606 = vmatmul.mubr.f32.vlgmr.msra.gmra.mrb[10].mxu1 %v4756_v46 }
 0x283   : > { %3282 = vmatpush3.bf16.msra.mxu1 %v5255_v0  ;;  %2842 = vmatprep.mubr.msk.f32.mxu1 %vm3703_vm0, %v5202_v22  ;;  %v5260_v0 = vld [vmem:[#allocation22_spill] sm:$0xff] }
 0x284   : > { %3283 = vmatprep.subr.bf16.mxu1 %v5252_v26 }
 0x287   : > { %3285 = vmatpush3.bf16.msra.mxu1 %v5256_v11  ;;  %v5262_v11 = vld [vmem:[#allocation28_spill] sm:$0xff] }
 0x288   : > { %3286 = vmatprep.subr.bf16.mxu1 %v5252_v26 }
 0x28b   : > { %3288 = vmatpush3.bf16.msra.mxu1 %v5257_v45  ;;  %v5263_v45 = vld [vmem:[#allocation30_spill] sm:$0xff] }
 0x28c   : > { %3289 = vmatprep.subr.bf16.mxu1 %v5252_v26 }
 0x28f   : > { %3291 = vmatpush3.bf16.msra.mxu1 %v5258_v61 }
 0x290   : > { %3292 = vmatprep.subr.bf16.mxu1 %v5252_v26 }
 0x293   : > { %3294 = vmatpush3.bf16.msra.mxu1 %v5259_v62 }
 0x294   : > { %3295 = vmatprep.subr.bf16.mxu1 %v5252_v26 }
 0x297   : > { %3297 = vmatpush3.bf16.msra.mxu1 %v5260_v0 }
 0x298   : > { %3298 = vmatprep.subr.bf16.mxu1 %v5252_v26 }
 0x29b   : > { %3300 = vmatpush3.bf16.msra.mxu1 %v5261_v1 }
 0x29c   : > { %3301 = vmatprep.subr.bf16.mxu1 %v5252_v26 }
 0x29f   : > { %3303 = vmatpush3.bf16.msra.mxu1 %v5262_v11 }
 0x2a0   : > { %3337 = vmatprep.subr.bf16.mxu1 %v5263_v45 }
 0x315   : > { %v1367_v7 = vpop.f32.mrb[12].mxu0 }
 0x316   : > { %v2809_v61 = vpop.f32.mrb[13].mxu0 }
 0x335   : > { %v1465_v62 = vpop.f32.mrb[8].mxu1  ;;  %v1536_v52 = vpop.f32.mrb[14].mxu0 }
 0x336   : > { %v1612_v19 = vadd.f32 %v1465_v62, %v4702_v34  ;;  %v1467_v0 = vpop.f32.mrb[9].mxu1  ;;  %v1538_v57 = vpop.f32.mrb[15].mxu0  ;;  %v1629_v62 = vadd.f32 %v4715_v43, %v1367_v7 }
 0x337   : > { %v1786_v18 = vadd.f32 %v1538_v57, %v535_v37  ;;  %v1613_v1 = vadd.f32 %v1467_v0, %v4708_v3 }
 0x338   : > { %v2596_v35 = vmul.f32 -1.442695, %v1612_v19  ;;  %v1614_v19 = vadd.f32 %v1536_v52, %v4719_v29 }
 0x339   : > { %v2599_v26 = vmul.f32 -1.442695, %v1786_v18  ;;  %v2597_v11 = vmul.f32 -1.442695, %v1613_v1  ;;  %v5266_v18 = vld [vmem:[#allocation63_spill] sm:$0xff] }
 0x33a   : > { %3626 = vpow2.f32 %v2596_v35  ;;  %v537_v35 = vadd.f32 %v5266_v18, %v4486_v24 }
 0x33b   : > { %3628 = vpow2.f32 %v2599_v26 }
 0x33c   : > { %3630 = vpow2.f32 %v2597_v11 }
 0x344   : > { %v3627_v45 = vpop.eup %3626 }
 0x345   : > { %v1619_v61 = vadd.f32 1.0, %v3627_v45  ;;  %v3629_v63 = vpop.eup %3628 }
 0x346   : > { %v1790_v6 = vadd.f32 1.0, %v3629_v63  ;;  %v3631_v39 = vpop.eup %3630 }
 0x347   : > { %3632 = vrcp.f32 %v1619_v61  ;;  %v1626_v14 = vadd.f32 1.0, %v3631_v39  ;;  %v5267_v39 = vld [vmem:[#allocation67_spill] sm:$0xff] }
 0x348   : > { %3634 = vrcp.f32 %v1790_v6  ;;  %v622_v7 = vadd.f32 %v5267_v39, %v4504_v8  ;;  %v5271_v39 = vld [vmem:[#allocation50_spill] sm:$0xff] }
 0x349   : > { %3636 = vrcp.f32 %v1626_v14 }
 0x351   : > { %v3633_v34 = vpop.eup %3632 }
 0x352   : > { %v1630_v57 = vmul.f32 %v3633_v34, %v1629_v62  ;;  %v3635_v45 = vpop.eup %3634 }
 0x353   : > { %v3637_v14 = vpop.eup %3636 }
 0x354   : > { %v1631_v26 = vadd.f32 %v1630_v57, %v1614_v19  ;;  %v1633_v34 = vsub.f32 1.0, %v3637_v14  ;;  %v1635_v19 = vmul.f32 %v3637_v14, %v4729_v48  ;;  %v5276_v14 = vld [vmem:[#allocation53_spill] sm:$0xff] }
 0x355   : > { %v1607_v0 = vpop.f32.mrb[10].mxu1 }
 0x356   : > { %3638 = vtanh.f32 %v1631_v26  ;;  %v1793_v11 = vadd.f32 %v1607_v0, %v537_v35  ;;  %v1609_v1 = vpop.f32.mrb[11].mxu1 }
 0x357   : > { %v1800_v63 = vadd.f32 %v4500_v28, %v1609_v1 }
 0x358   : > { %v2600_v37 = vmul.f32 -1.442695, %v1793_v11 }
 0x359   : > { %v1801_v61 = vmul.f32 %v3635_v45, %v1800_v63  ;;  %v5269_v45 = vld [vmem:[#allocation7_spill] sm:$0xff] }
 0x35a   : > { %3640 = vpow2.f32 %v2600_v37  ;;  %v5270_v37 = vld [vmem:[#allocation8_spill] sm:$0xff] }
 0x35b   : > { %v1802_v52 = vadd.f32 %v1801_v61, %v622_v7  ;;  %v5273_v7 = vld [vmem:[#allocation52_spill] sm:$0xff]  ;;  %v5274_v61 = vld [vmem:[#allocation10_spill] sm:$0xff] }
 0x360   : > { %v3639_v6 = vpop.eup %3638 }
 0x361   : > { %v1634_v62 = vmul.f32 %v3639_v6, %v1633_v34  ;;  %v5277_v34 = vld [vmem:[#allocation54_spill] sm:$0xff]  ;;  %v5278_v6 = vld [vmem:[#allocation13_spill] sm:$0xff] }
 0x363   : > { %v4839_v57 = vadd.f32 %v1635_v19, %v1634_v62  ;;  %v5279_v62 = vld [vmem:[#allocation17_spill] sm:$0xff]  ;;  %v5280_v19 = vld [vmem:[#allocation55_spill] sm:$0xff] }
 0x364   : > { %v3641_v18 = vpop.eup %3640 }
 0x365   : > { %v1797_v35 = vadd.f32 1.0, %v3641_v18  ;;  %2598 = vst [vmem:[%s3783_s20 + $0x8] sm:$0xff] %v4839_v57  ;;  %1704 = vmatmul.mubr.f32.vlgmr.msra.gmra.mrb[16].mxu0 %v4839_v57  ;;  %2843 = vmatmul.mubr.f32.vlgmr.msra.gmra.mrb[12].mxu1 %v4839_v57  ;;  %v5282_v18 = vld [vmem:[#allocation18_spill] sm:$0xff] }
 0x366   : > { %3307 = vmatpush1.bf16.msra.mxu0 %v4184_v40  ;;  %3339 = vmatpush1.bf16.msra.mxu1 %v4200_v50 }
 0x367   : > { %3642 = vrcp.f32 %v1797_v35  ;;  %3309 = vmatprep.subr.bf16.mxu0 %v4213_v54  ;;  %3341 = vmatprep.subr.bf16.mxu1 %v4239_v2  ;;  %v5283_v35 = vld [vmem:[#allocation20_spill] sm:$0xff] }
 0x368   : > { %1872 = vmatprep.mubr.f32.mxu0 %v5202_v22  ;;  %1943 = vmatprep.mubr.f32.mxu1 %v5202_v22  ;;  %3644 = vtanh.f32 %v1802_v52  ;;  %v5275_v52 = vld [vmem:[#allocation11_spill] sm:$0xff] }
 0x36a   : > { %3311 = vmatpush1.bf16.msra.mxu0 %v4225_v60  ;;  %3343 = vmatpush1.bf16.msra.mxu1 %v4241_v4 }
 0x36b   : > { %3313 = vmatprep.subr.bf16.mxu0 %v4252_v12  ;;  %3345 = vmatprep.subr.bf16.mxu1 %v4268_v21 }
 0x36e   : > { %3315 = vmatpush1.bf16.msra.mxu0 %v4266_v17  ;;  %3347 = vmatpush1.bf16.msra.mxu1 %v4278_v27 }
 0x36f   : > { %3317 = vmatprep.subr.bf16.mxu0 %v4288_v31  ;;  %3349 = vmatprep.subr.bf16.mxu1 %v4312_v53 }
 0x371   : > { %v3643_v48 = vpop.eup %3642 }
 0x372   : > { %3319 = vmatpush1.bf16.msra.mxu0 %v4299_v41  ;;  %3351 = vmatpush1.bf16.msra.mxu1 %v4314_v56  ;;  %v1804_v26 = vsub.f32 1.0, %v3643_v48  ;;  %v3645_v0 = vpop.eup %3644  ;;  %v1806_v1 = vmul.f32 %v3643_v48, %v4756_v46  ;;  %v5268_v46 = vld [vmem:[#allocation49_spill] sm:$0xff] }
 0x373   : > { %3321 = vmatprep.subr.bf16.mxu0 %v5226_v36  ;;  %3353 = vmatprep.subr.bf16.mxu1 %v5227_v38  ;;  %v5284_v48 = vld [vmem:[#allocation57_spill] sm:$0xff] }
 0x374   : > { %v1805_v11 = vmul.f32 %v3645_v0, %v1804_v26  ;;  %v5285_v26 = vld [vmem:[#allocation58_spill] sm:$0xff]  ;;  %v5286_v0 = vld [vmem:[#allocation21_spill] sm:$0xff] }
 0x376   : > { %3323 = vmatpush1.bf16.msra.mxu0 %v5228_v10  ;;  %3355 = vmatpush1.bf16.msra.mxu1 %v5229_v20  ;;  %v4866_v63 = vadd.f32 %v1806_v1, %v1805_v11  ;;  %v5287_v11 = vld [vmem:[#allocation23_spill] sm:$0xff] }
 0x377   : > { %3325 = vmatprep.subr.bf16.mxu0 %v5230_v15  ;;  %3357 = vmatprep.subr.bf16.mxu1 %v5231_v55  ;;  %v5288_v1 = vld [vmem:[#allocation59_spill] sm:$0xff] }
 0x37a   : > { %3327 = vmatpush1.bf16.msra.mxu0 %v5232_v58  ;;  %3359 = vmatpush1.bf16.msra.mxu1 %v5233_v49 }
 0x37b   : > { %3329 = vmatprep.subr.bf16.mxu0 %v5234_v23  ;;  %3361 = vmatprep.subr.bf16.mxu1 %v5235_v13 }
 0x37e   : > { %3331 = vmatpush1.bf16.msra.mxu0 %v5236_v32  ;;  %3363 = vmatpush1.bf16.msra.mxu1 %v5237_v59 }
 0x37f   : > { %3333 = vmatprep.subr.bf16.mxu0 %v5238_v9  ;;  %3365 = vmatprep.subr.bf16.mxu1 %v5239_v51 }
 0x382   : > { %3335 = vmatpush1.bf16.msra.mxu0 %v5240_v47  ;;  %3367 = vmatpush1.bf16.msra.mxu1 %v5241_v44 }
 0x383   : > { %3369 = vmatprep.subr.bf16.mxu0 %v5242_v42  ;;  %3401 = vmatprep.subr.bf16.mxu1 %v5243_v33  ;;  %v5272_v33 = vld [vmem:[#allocation9_spill] sm:$0xff] }
 0x385   : > { %1873 = vmatmul.mubr.f32.vlgmr.msra.gmra.mrb[16].mxu0 %v4866_v63  ;;  %1944 = vmatmul.mubr.f32.vlgmr.msra.gmra.mrb[14].mxu1 %v4866_v63 }
 0x386   : > { %3371 = vmatpush1.bf16.msra.mxu0 %v5268_v46  ;;  %2014 = vmatprep.mubr.f32.mxu0 %v5202_v22 }
 0x387   : > { %3373 = vmatprep.subr.bf16.mxu0 %v4524_v30  ;;  %3403 = vmatpush1.bf16.msra.mxu1 %v5269_v45  ;;  %v5289_v45 = vld [vmem:[#allocation60_spill] sm:$0xff] }
 0x388   : > { %3405 = vmatprep.subr.bf16.mxu1 %v5270_v37  ;;  %2112 = vmatprep.mubr.f32.mxu1 %v5202_v22  ;;  %v5290_v37 = vld [vmem:[#allocation24_spill] sm:$0xff] }
 0x38a   : > { %3375 = vmatpush1.bf16.msra.mxu0 %v4541_v16 }
 0x38b   : > { %3377 = vmatprep.subr.bf16.mxu0 %v5271_v39  ;;  %3407 = vmatpush1.bf16.msra.mxu1 %v3974_v25  ;;  %v5281_v25 = vld [vmem:[#allocation56_spill] sm:$0xff] }
 0x38c   : > { %3409 = vmatprep.subr.bf16.mxu1 %v5272_v33  ;;  %v5291_v33 = vld [vmem:[#allocation26_spill] sm:$0xff] }
 0x38e   : > { %3379 = vmatpush1.bf16.msra.mxu0 %v5244_v5 }
 0x38f   : > { %3381 = vmatprep.subr.bf16.mxu0 %v5273_v7  ;;  %3411 = vmatpush1.bf16.msra.mxu1 %v5274_v61  ;;  %v5292_v61 = vld [vmem:[#allocation61_spill] sm:$0xff] }
 0x390   : > { %3413 = vmatprep.subr.bf16.mxu1 %v5275_v52  ;;  %v5293_v52 = vmov 0.0|0.0  }
 0x392   : > { %3383 = vmatpush1.bf16.msra.mxu0 %v5276_v14 }
 0x393   : > { %3385 = vmatprep.subr.bf16.mxu0 %v5277_v34  ;;  %3415 = vmatpush1.bf16.msra.mxu1 %v5278_v6  ;;  %v5294_v6 = vld [vmem:[#allocation27_spill] sm:$0xff] }
 0x394   : > { %3417 = vmatprep.subr.bf16.mxu1 %v5279_v62  ;;  %v5295_v62 = vld [vmem:[#allocation29_spill] sm:$0xff] }
 0x396   : > { %3387 = vmatpush1.bf16.msra.mxu0 %v5280_v19 }
 0x397   : > { %3389 = vmatprep.subr.bf16.mxu0 %v5281_v25  ;;  %3419 = vmatpush1.bf16.msra.mxu1 %v5282_v18  ;;  %v5296_v18 = vld [vmem:[#allocation12_spill] sm:$0xff] }
 0x398   : > { %3421 = vmatprep.subr.bf16.mxu1 %v5283_v35  ;;  %v5297_v35 = vld [vmem:[#allocation14_spill] sm:$0xff] }
 0x39a   : > { %3391 = vmatpush1.bf16.msra.mxu0 %v5284_v48 }
 0x39b   : > { %3393 = vmatprep.subr.bf16.mxu0 %v5285_v26  ;;  %3423 = vmatpush1.bf16.msra.mxu1 %v5286_v0  ;;  %v5298_v0 = vld [vmem:[#allocation15_spill] sm:$0xff]  ;;  %v5307_v26 = vld [vmem:[#allocation68_spill] sm:$0xff] }
 0x39c   : > { %3425 = vmatprep.subr.bf16.mxu1 %v5287_v11  ;;  %v5299_v11 = vld [vmem:[#allocation16_spill] sm:$0xff] }
 0x39e   : > { %3395 = vmatpush1.bf16.msra.mxu0 %v5288_v1 }
 0x39f   : > { %3397 = vmatprep.subr.bf16.mxu0 %v5289_v45  ;;  %3427 = vmatpush1.bf16.msra.mxu1 %v5290_v37  ;;  %v5300_v37 = vld [vmem:[#allocation19_spill] sm:$0xff] }
 0x3a0   : > { %3429 = vmatprep.subr.bf16.mxu1 %v5291_v33  ;;  %v5301_v33 = vld [vmem:[#allocation22_spill] sm:$0xff] }
 0x3a2   : > { %3399 = vmatpush1.bf16.msra.mxu0 %v5292_v61  ;;  %v5306_v61 = vld [vmem:[#allocation64_spill] sm:$0xff] }
 0x3a3   : > { %3432 = vmatprep.subr.bf16.mxu0 %v5293_v52  ;;  %3431 = vmatpush1.bf16.msra.mxu1 %v5294_v6  ;;  %v5302_v6 = vld [vmem:[#allocation25_spill] sm:$0xff] }
 0x3a4   : > { %3457 = vmatprep.subr.bf16.mxu1 %v5295_v62  ;;  %v5303_v62 = vld [vmem:[#allocation28_spill] sm:$0xff] }
 0x3a5   : > { %2015 = vmatmul.mubr.f32.vlgmr.msra.gmra.mrb[18].mxu0 %v4866_v63 }
 0x3a6   : > { %3434 = vmatpush3.bf16.msra.mxu0 %v5296_v18  ;;  %2877 = vmatprep.mubr.msk.f32.mxu0 %vm3703_vm0, %v5202_v22  ;;  %v5304_v18 = vld [vmem:[#allocation30_spill] sm:$0xff] }
 0x3a7   : > { %3435 = vmatprep.subr.bf16.mxu0 %v5293_v52 }
 0x3aa   : > { %3437 = vmatpush3.bf16.msra.mxu0 %v5297_v35 }
 0x3ab   : > { %3438 = vmatprep.subr.bf16.mxu0 %v5293_v52 }
 0x3ae   : > { %3440 = vmatpush3.bf16.msra.mxu0 %v5298_v0 }
 0x3af   : > { %3441 = vmatprep.subr.bf16.mxu0 %v5293_v52 }
 0x3b2   : > { %3443 = vmatpush3.bf16.msra.mxu0 %v5299_v11  ;;  %v5305_v11 = vld [vmem:[#allocation48_spill] sm:$0xff] }
 0x3b3   : > { %3444 = vmatprep.subr.bf16.mxu0 %v5293_v52  ;;  %v541_v45 = vadd.f32 %v5306_v61, %v5305_v11 }
 0x3b6   : > { %3446 = vmatpush3.bf16.msra.mxu0 %v5300_v37 }
 0x3b7   : > { %3447 = vmatprep.subr.bf16.mxu0 %v5293_v52 }
 0x3ba   : > { %3449 = vmatpush3.bf16.msra.mxu0 %v5301_v33 }
 0x3bb   : > { %3450 = vmatprep.subr.bf16.mxu0 %v5293_v52 }
 0x3be   : > { %3452 = vmatpush3.bf16.msra.mxu0 %v5302_v6 }
 0x3bf   : > { %3453 = vmatprep.subr.bf16.mxu0 %v5293_v52 }
 0x3c2   : > { %3455 = vmatpush3.bf16.msra.mxu0 %v5303_v62 }
 0x3c3   : > { %3489 = vmatprep.subr.bf16.mxu0 %v5304_v18 }
 0x438   : > { %v1776_v35 = vpop.f32.mrb[12].mxu1 }
 0x439   : > { %v2844_v0 = vpop.f32.mrb[13].mxu1 }
 0x458   : > { %v1874_v37 = vpop.f32.mrb[16].mxu0  ;;  %v1945_v1 = vpop.f32.mrb[14].mxu1 }
 0x459   : > { %v2021_v48 = vadd.f32 %v1874_v37, %v5307_v26  ;;  %v1876_v33 = vpop.f32.mrb[17].mxu0  ;;  %v1947_v25 = vpop.f32.mrb[15].mxu1  ;;  %v2038_v37 = vadd.f32 %v4715_v43, %v1776_v35  ;;  %v5309_v35 = vld [vmem:[#allocation65_spill] sm:$0xff] }
 0x45a   : > { %v2195_v19 = vadd.f32 %v1947_v25, %v541_v45  ;;  %v2022_v6 = vadd.f32 %v1876_v33, %v4708_v3  ;;  %v2023_v25 = vadd.f32 %v1945_v1, %v4719_v29 }
 0x45b   : > { %v2601_v34 = vmul.f32 -1.442695, %v2021_v48 }
 0x45c   : > { %v2604_v52 = vmul.f32 -1.442695, %v2195_v19  ;;  %v2602_v62 = vmul.f32 -1.442695, %v2022_v6 }
 0x45d   : > { %3646 = vpow2.f32 %v2601_v34  ;;  %v5308_v34 = vld [vmem:[#allocation66_spill] sm:$0xff] }
 0x45e   : > { %3648 = vpow2.f32 %v2604_v52  ;;  %v543_v19 = vadd.f32 %v5308_v34, %v4486_v24 }
 0x45f   : > { %3650 = vpow2.f32 %v2602_v62 }
 0x467   : > { %v3647_v18 = vpop.eup %3646 }
 0x468   : > { %v2028_v0 = vadd.f32 1.0, %v3647_v18  ;;  %v3649_v14 = vpop.eup %3648 }
 0x469   : > { %v2199_v61 = vadd.f32 1.0, %v3649_v14  ;;  %v3651_v11 = vpop.eup %3650 }
 0x46a   : > { %3652 = vrcp.f32 %v2028_v0  ;;  %v2035_v7 = vadd.f32 1.0, %v3651_v11  ;;  %v627_v0 = vadd.f32 %v5309_v35, %v4504_v8  ;;  %v5319_v8 = vld [vmem:[#allocation61_spill] sm:$0xff] }
 0x46b   : > { %3654 = vrcp.f32 %v2199_v61 }
 0x46c   : > { %3656 = vrcp.f32 %v2035_v7 }
 0x474   : > { %v3653_v26 = vpop.eup %3652 }
 0x475   : > { %v2039_v48 = vmul.f32 %v3653_v26, %v2038_v37  ;;  %v3655_v62 = vpop.eup %3654 }
 0x476   : > { %v3657_v7 = vpop.eup %3656 }
 0x477   : > { %v2040_v45 = vadd.f32 %v2039_v48, %v2023_v25  ;;  %v2042_v1 = vsub.f32 1.0, %v3657_v7  ;;  %v2044_v37 = vmul.f32 %v3657_v7, %v4839_v57 }
 0x478   : > { %v2016_v33 = vpop.f32.mrb[18].mxu0 }
 0x479   : > { %3658 = vtanh.f32 %v2040_v45  ;;  %v2202_v6 = vadd.f32 %v2016_v33, %v543_v19  ;;  %v2018_v52 = vpop.f32.mrb[19].mxu0 }
 0x47a   : > { %v2209_v14 = vadd.f32 %v4500_v28, %v2018_v52  ;;  %v5318_v28 = vld [vmem:[#allocation60_spill] sm:$0xff] }
 0x47b   : > { %v2605_v18 = vmul.f32 -1.442695, %v2202_v6 }
 0x47c   : > { %v2210_v61 = vmul.f32 %v3655_v62, %v2209_v14 }
 0x47d   : > { %3660 = vpow2.f32 %v2605_v18 }
 0x47e   : > { %v2211_v26 = vadd.f32 %v2210_v61, %v627_v0 }
 0x483   : > { %v3659_v11 = vpop.eup %3658 }
 0x484   : > { %v2043_v24 = vmul.f32 %v3659_v11, %v2042_v1 }
 0x486   : > { %v4949_v25 = vadd.f32 %v2044_v37, %v2043_v24 }
 0x487   : > { %v3661_v48 = vpop.eup %3660 }
 0x488   : > { %v2206_v34 = vadd.f32 1.0, %v3661_v48  ;;  %2603 = vst [vmem:[%s3783_s20 + $0x10] sm:$0xff] %v4949_v25  ;;  %2113 = vmatmul.mubr.f32.vlgmr.msra.gmra.mrb[16].mxu1 %v4949_v25  ;;  %2878 = vmatmul.mubr.f32.vlgmr.msra.gmra.mrb[20].mxu0 %v4949_v25 }
 0x489   : > { %3459 = vmatpush1.bf16.msra.mxu1 %v4184_v40  ;;  %3491 = vmatpush1.bf16.msra.mxu0 %v4200_v50 }
 0x48a   : > { %3662 = vrcp.f32 %v2206_v34  ;;  %3461 = vmatprep.subr.bf16.mxu1 %v4213_v54  ;;  %3493 = vmatprep.subr.bf16.mxu0 %v4239_v2 }
 0x48b   : > { %2281 = vmatprep.mubr.f32.mxu1 %v5202_v22  ;;  %2352 = vmatprep.mubr.f32.mxu0 %v5202_v22  ;;  %3664 = vtanh.f32 %v2211_v26 }
 0x48d   : > { %3463 = vmatpush1.bf16.msra.mxu1 %v4225_v60  ;;  %3495 = vmatpush1.bf16.msra.mxu0 %v4241_v4 }
 0x48e   : > { %3465 = vmatprep.subr.bf16.mxu1 %v4252_v12  ;;  %3497 = vmatprep.subr.bf16.mxu0 %v4268_v21  ;;  %v5310_v12 = vld [vmem:[#allocation52_spill] sm:$0xff]  ;;  %v5312_v21 = vld [vmem:[#allocation54_spill] sm:$0xff] }
 0x491   : > { %3467 = vmatpush1.bf16.msra.mxu1 %v4266_v17  ;;  %3499 = vmatpush1.bf16.msra.mxu0 %v4278_v27  ;;  %v5311_v17 = vld [vmem:[#allocation53_spill] sm:$0xff]  ;;  %v5313_v27 = vld [vmem:[#allocation55_spill] sm:$0xff] }
 0x492   : > { %3469 = vmatprep.subr.bf16.mxu1 %v4288_v31  ;;  %3501 = vmatprep.subr.bf16.mxu0 %v4312_v53  ;;  %v5314_v31 = vld [vmem:[#allocation56_spill] sm:$0xff]  ;;  %v5316_v53 = vld [vmem:[#allocation58_spill] sm:$0xff] }
 0x494   : > { %v3663_v40 = vpop.eup %3662 }
 0x495   : > { %3471 = vmatpush1.bf16.msra.mxu1 %v4299_v41  ;;  %3503 = vmatpush1.bf16.msra.mxu0 %v4314_v56  ;;  %v2213_v50 = vsub.f32 1.0, %v3663_v40  ;;  %v3665_v54 = vpop.eup %3664  ;;  %v2215_v2 = vmul.f32 %v3663_v40, %v4866_v63  ;;  %v5315_v41 = vld [vmem:[#allocation57_spill] sm:$0xff]  ;;  %v5317_v56 = vld [vmem:[#allocation59_spill] sm:$0xff] }
 0x496   : > { %3473 = vmatprep.subr.bf16.mxu1 %v5226_v36  ;;  %3505 = vmatprep.subr.bf16.mxu0 %v5227_v38  ;;  %v5320_v38 = vld [vmem:[#allocation68_spill] sm:$0xff] }
 0x497   : > { %v2214_v60 = vmul.f32 %v3665_v54, %v2213_v50 }
 0x499   : > { %3475 = vmatpush1.bf16.msra.mxu1 %v5228_v10  ;;  %3507 = vmatpush1.bf16.msra.mxu0 %v5229_v20  ;;  %v4976_v4 = vadd.f32 %v2215_v2, %v2214_v60 }
 0x49a   : > { %3477 = vmatprep.subr.bf16.mxu1 %v5230_v15  ;;  %3509 = vmatprep.subr.bf16.mxu0 %v5231_v55 }
 0x49b   : > { %2457 = vst [vmem:[#allocation3] sm:$0xff] %v4976_v4  ;;  %2466 = vst [vmem:[%s5043_s9] sm:$0xff] (!%p2609_p6), %v4976_v4 }
 0x49d   : > { %3479 = vmatpush1.bf16.msra.mxu1 %v5232_v58  ;;  %3511 = vmatpush1.bf16.msra.mxu0 %v5233_v49 }
 0x49e   : > { %3481 = vmatprep.subr.bf16.mxu1 %v5234_v23  ;;  %3513 = vmatprep.subr.bf16.mxu0 %v5235_v13 }
 0x4a1   : > { %3483 = vmatpush1.bf16.msra.mxu1 %v5236_v32  ;;  %3515 = vmatpush1.bf16.msra.mxu0 %v5237_v59 }
 0x4a2   : > { %3485 = vmatprep.subr.bf16.mxu1 %v5238_v9  ;;  %3517 = vmatprep.subr.bf16.mxu0 %v5239_v51 }
 0x4a5   : > { %3487 = vmatpush1.bf16.msra.mxu1 %v5240_v47  ;;  %3519 = vmatpush1.bf16.msra.mxu0 %v5241_v44 }
 0x4a6   : > { %3521 = vmatprep.subr.bf16.mxu1 %v5242_v42 }
 0x4a8   : > { %2282 = vmatmul.mubr.f32.vlgmr.msra.gmra.mrb[16].mxu1 %v4976_v4  ;;  %2353 = vmatmul.mubr.f32.vlgmr.msra.gmra.mrb[22].mxu0 %v4976_v4 }
 0x4a9   : > { %3523 = vmatpush1.bf16.msra.mxu1 %v5268_v46  ;;  %2423 = vmatprep.mubr.f32.mxu1 %v5202_v22 }
 0x4aa   : > { %3525 = vmatprep.subr.bf16.mxu1 %v4524_v30 }
 0x4ad   : > { %3527 = vmatpush1.bf16.msra.mxu1 %v4541_v16 }
 0x4ae   : > { %3529 = vmatprep.subr.bf16.mxu1 %v5271_v39 }
 0x4b1   : > { %3531 = vmatpush1.bf16.msra.mxu1 %v5244_v5 }
 0x4b2   : > { %3533 = vmatprep.subr.bf16.mxu1 %v5310_v12 }
 0x4b5   : > { %3535 = vmatpush1.bf16.msra.mxu1 %v5311_v17 }
 0x4b6   : > { %3537 = vmatprep.subr.bf16.mxu1 %v5312_v21 }
 0x4b9   : > { %3539 = vmatpush1.bf16.msra.mxu1 %v5313_v27 }
 0x4ba   : > { %3541 = vmatprep.subr.bf16.mxu1 %v5314_v31 }
 0x4bd   : > { %3543 = vmatpush1.bf16.msra.mxu1 %v5315_v41 }
 0x4be   : > { %3545 = vmatprep.subr.bf16.mxu1 %v5316_v53 }
 0x4c1   : > { %3547 = vmatpush1.bf16.msra.mxu1 %v5317_v56 }
 0x4c2   : > { %3549 = vmatprep.subr.bf16.mxu1 %v5318_v28 }
 0x4c5   : > { %3551 = vmatpush1.bf16.msra.mxu1 %v5319_v8 }
 0x4c8   : > { %2424 = vmatmul.mubr.f32.vlgmr.msra.gmra.mrb[18].mxu1 %v4976_v4 }
 0x55b   : > { %v2185_v30 = vpop.f32.mrb[20].mxu0 }
 0x55c   : > { %v2879_v16 = vpop.f32.mrb[21].mxu0  ;;  %v2447_v9 = vadd.f32 %v4715_v43, %v2185_v30 }
 0x57b   : > { %v2283_v22 = vpop.f32.mrb[16].mxu1  ;;  %v2354_v36 = vpop.f32.mrb[22].mxu0 }
 0x57c   : > { %v2430_v10 = vadd.f32 %v2283_v22, %v5320_v38  ;;  %v2285_v20 = vpop.f32.mrb[17].mxu1  ;;  %v2356_v15 = vpop.f32.mrb[23].mxu0  ;;  %v2432_v47 = vadd.f32 %v2354_v36, %v4719_v29 }
 0x57d   : > { %2459 = vst [vmem:[#allocation5] sm:$0xff] %v2356_v15  ;;  %v2431_v58 = vadd.f32 %v2285_v20, %v4708_v3 }
 0x57e   : > { %v2606_v55 = vmul.f32 -1.442695, %v2430_v10 }
 0x57f   : > { %v2607_v49 = vmul.f32 -1.442695, %v2431_v58 }
 0x580   : > { %3666 = vpow2.f32 %v2606_v55 }
 0x581   : > { %3668 = vpow2.f32 %v2607_v49 }
 0x58a   : > { %v3667_v23 = vpop.eup %3666 }
 0x58b   : > { %v2437_v13 = vadd.f32 1.0, %v3667_v23  ;;  %v3669_v32 = vpop.eup %3668 }
 0x58c   : > { %v2444_v59 = vadd.f32 1.0, %v3669_v32 }
 0x58d   : > { %3670 = vrcp.f32 %v2437_v13 }
 0x58e   : > { %3672 = vrcp.f32 %v2444_v59 }
 0x597   : > { %v3671_v51 = vpop.eup %3670 }
 0x598   : > { %v2448_v44 = vmul.f32 %v3671_v51, %v2447_v9  ;;  %v3673_v57 = vpop.eup %3672 }
 0x599   : > { %v2451_v63 = vsub.f32 1.0, %v3673_v57  ;;  %v2453_v19 = vmul.f32 %v3673_v57, %v4949_v25 }
 0x59a   : > { %v2449_v42 = vadd.f32 %v2448_v44, %v2432_v47 }
 0x59b   : > { %v2425_v5 = vpop.f32.mrb[18].mxu1 }
 0x59c   : > { %3674 = vtanh.f32 %v2449_v42  ;;  %2460 = vst [vmem:[#allocation5 + $0x8] sm:$0xff] %v2425_v5  ;;  %v2427_v3 = vpop.f32.mrb[19].mxu1 }
 0x59d   : > { %2461 = vst [vmem:[#allocation5 + $0x10] sm:$0xff] %v2427_v3 }
 0x5a5   : > { %2465 = sbr.rel (%p2609_p6) target bundleno = 1453 (0x5ad), region = 60 }
 0x5a6   : > { %v3675_v46 = vpop.eup %3674 }
 0x5a7   : > { %v2452_v39 = vmul.f32 %v3675_v46, %v2451_v63 }
 0x5a9   : > { %v2454_v45 = vadd.f32 %v2453_v19, %v2452_v39 }
 0x5ab   : > { %2608 = vst [vmem:[%s3783_s20 + $0x18] sm:$0xff] %v2454_v45  ;;  %2458 = vst [vmem:[#allocation4] sm:$0xff] %v2454_v45 }
 0x5ac   : > { %2610 = vst [vmem:[%s5043_s9 + $0x8] sm:$0xff] %v2454_v45 }
 0x5ad PF: > { %s20_s11 = sadd.s32 1, %s3698_s11   ;;  %s5321_s30 = smov %s3694_s10 }
 0x5ae   : > { %p17_p7 = scmp.ge.s32.totalorder %s20_s11, 4   ;;  %s5322_s10 = smov %s5324_s12 }
 0x5b0   :  { %19 = sbr.rel (!%p17_p7) target bundleno = 2 (0x2), region = 110 }

</bundles_post_ra>
